<compile_context>
chip_gen: v7x
topology: tpu7x:2x2x1
jax: 0.10.0
libtpu: 0.0.40
codegen_flags: <defaults>
</compile_context>

<pallas_src>
import jax
import jax.numpy as jnp
from jax.experimental import pallas as pl
from jax.experimental.pallas import tpu as pltpu

# ----- model hyper-parameters (small, consistent with the module) -----
B = 2             # batch
L = 8             # padded sequence length
HIDDEN = 32       # hidden_dim
HEADS = 4         # num_heads
D_K = HIDDEN // HEADS
NUM_LAYERS = 2
REPR_IN = 53      # my_repr_indim
REPR_PAD = 56     # REPR_IN padded to a multiple of 8 (zero-padded)
REPR_HID = 32     # hidden width of repr_linear
LN_EPS = 1e-5
NEG_INF = -1e30   # stand-in for float('-inf'); exp() underflows to exactly 0

BL = B * L        # 16 : folded batch*seq tile rows
BLL = B * L * L   # 128: flattened (b, i, j) lane axis of the repr logits

# ----- parameter-slab row layout (all starts multiples of 8) -----
ROW_S = 0                       # S   : (16,128) row-selection constant
ROW_GT = 16                     # GT  : (16,128) column-gather constant (transposed)
ROW_LAYER0 = 32
OFF_WQKV = 0                    # (32, 96)  cols 0:96   (Wq pre-scaled by 1/sqrt(d_k))
OFF_WO = 32                     # (32, 32)  cols 0:32
OFF_RW1T = 64                   # (32, 56)  cols 0:56 ; rb1T column at col 56
OFF_SMALL = 96                  # 8 rows of small per-layer constants
LAYER_ROWS = 104
ROW_FINAL = ROW_LAYER0 + NUM_LAYERS * LAYER_ROWS    # final LayerNorm gamma/beta
PAR_ROWS = ROW_FINAL + 8                            # 248

# ----- data-slab layout (runtime inputs), shape (DATA_ROWS, 128) -----
COL_X = 0                       # rows 0:16, cols  0:32  : x_flat
COL_MASK = HIDDEN               # rows 0:16, cols 32:48  : additive block-diag mask
COL_POOL = HIDDEN + BL          # rows 0:2 , cols 48:64  : masked pooling matrix
DATA_ROWS = BL + REPR_PAD       # rows 16:72             : rcT (refCov flat, transposed)


# =====================================================================
# Fused Pallas kernel: whole StackedAttention forward in one launch
# =====================================================================
def fused_forward_kernel(data_ref, par_ref, out_ref):
    hdr = data_ref[0:BL, :]                                    # (16,128)
    x = hdr[:, COL_X:COL_X + HIDDEN]                           # (16,32)
    add_mask = hdr[:, COL_MASK:COL_MASK + BL]                  # (16,16)
    pool = hdr[0:B, COL_POOL:COL_POOL + BL]                    # (2,16)
    rcT = data_ref[BL:BL + REPR_PAD, :]                        # (56,128)

    S = par_ref[ROW_S:ROW_S + BL, :]                           # (16,128)
    GT = par_ref[ROW_GT:ROW_GT + BL, :]                        # (16,128)

    inv_h = 1.0 / HIDDEN

    def layer_norm(y, g, bta):
        mean = jnp.sum(y, axis=-1, keepdims=True) * inv_h
        d = y - mean
        var = jnp.sum(d * d, axis=-1, keepdims=True) * inv_h
        return d * jax.lax.rsqrt(var + LN_EPS) * g + bta

    def masked_softmax(logits):
        # Single additive mask: -1e30 on invalid / cross-batch entries.
        # All-invalid rows need no special case: every entry rounds to exactly
        # -1e30, the max-subtraction cancels and exp(0)=1 -> uniform row
        # (those rows never reach the pooled output).
        m = logits + add_mask
        mx = jnp.max(m, axis=-1, keepdims=True)
        e = jnp.exp(m - mx)
        return e / jnp.sum(e, axis=-1, keepdims=True)

    for ly in range(NUM_LAYERS):
        base = ROW_LAYER0 + ly * LAYER_ROWS
        wqkv_rows = par_ref[base + OFF_WQKV:base + OFF_WQKV + HIDDEN, :]
        wo_rows = par_ref[base + OFF_WO:base + OFF_WO + HIDDEN, :]
        rw1_rows = par_ref[base + OFF_RW1T:base + OFF_RW1T + REPR_HID, :]
        small = par_ref[base + OFF_SMALL:base + OFF_SMALL + 8, :]

        wqkv = wqkv_rows[:, 0:3 * HIDDEN]                      # (32,96)
        wo = wo_rows[:, 0:HIDDEN]                              # (32,32)
        rw1T = rw1_rows[:, 0:REPR_PAD]                         # (32,56)
        rb1T = rw1_rows[:, REPR_PAD:REPR_PAD + 1]              # (32,1)
        bqkv = small[0:1, 0:3 * HIDDEN]                        # (1,96)
        bo = small[1:2, 0:HIDDEN]                              # (1,32)
        gamma = small[2:3, 0:HIDDEN]                           # (1,32)
        beta = small[3:4, 0:HIDDEN]                            # (1,32)
        rw2T = small[4:8, 0:REPR_HID]                          # (4,32)
        rb2 = small[4:8, REPR_HID:REPR_HID + 1]                # (4,1)

        # ---- repr MLP in transposed layout: logits for ALL heads at once ----
        h1T = jnp.dot(rw1T, rcT, preferred_element_type=jnp.float32) + rb1T   # (32,128)
        h1T = jnp.maximum(h1T, 0.0)
        rlogT = jnp.dot(rw2T, h1T, preferred_element_type=jnp.float32) + rb2  # (4,128)

        # ---- fused QKV projection over all B*L rows (Wq pre-scaled) ----
        qkv = jnp.dot(x, wqkv, preferred_element_type=jnp.float32) + bqkv     # (16,96)

        head_outs = []
        for h in range(HEADS):
            q_h = qkv[:, h * D_K:(h + 1) * D_K]
            k_h = qkv[:, HIDDEN + h * D_K:HIDDEN + (h + 1) * D_K]
            v_h = qkv[:, 2 * HIDDEN + h * D_K:2 * HIDDEN + (h + 1) * D_K]

            scores = jax.lax.dot_general(
                q_h, k_h, (((1,), (1,)), ((), ())),
                preferred_element_type=jnp.float32)            # (16,16) block-diag valid
            attn_w = masked_softmax(scores)

            # block-diagonal (16,16) ref-logit tile via ONE gather matmul
            prod = S * rlogT[h:h + 1, :]                       # (16,128)
            ref_log = jax.lax.dot_general(
                prod, GT, (((1,), (1,)), ((), ())),
                preferred_element_type=jnp.float32)            # (16,16)
            ref_w = masked_softmax(ref_log)

            # both softmaxes are proper row distributions -> row sum is 2
            comb = (attn_w + ref_w) * 0.5
            head_outs.append(jnp.dot(comb, v_h,
                                     preferred_element_type=jnp.float32))     # (16,8)

        heads = jnp.concatenate(head_outs, axis=-1)            # (16,32), lane order = head order
        proj = jnp.dot(heads, wo, preferred_element_type=jnp.float32) + bo
        x = layer_norm(x + proj, gamma, beta)

    fin = par_ref[ROW_FINAL:ROW_FINAL + 8, :]
    y = layer_norm(x, fin[0:1, 0:HIDDEN], fin[1:2, 0:HIDDEN])
    # masked pooling folded into a (2,16)@(16,32) matmul
    out_ref[...] = jnp.dot(pool, y, preferred_element_type=jnp.float32)


# =====================================================================
# Wrapper
# =====================================================================
@jax.jit
def stacked_attention_pallas(x_nodes, mask, refCov, param_slab):
    # ---- runtime data slab (one lane-dense DMA) ----
    x = process_node_feature(x_nodes, mask)                    # (B, L, HIDDEN)
    x_flat = x.reshape(BL, HIDDEN)
    mask_f = mask.astype(jnp.float32)
    m_flat = mask_f.reshape(BL)
    batch_id = jnp.repeat(jnp.arange(B), L)                    # (16,)
    same_b = (batch_id[:, None] == batch_id[None, :]).astype(jnp.float32)
    valid = same_b * m_flat[:, None] * m_flat[None, :]         # (16,16) block-diag validity
    add_mask = jnp.where(valid > 0.5, 0.0, NEG_INF)            # additive mask
    pool = ((jnp.arange(B)[:, None] == batch_id[None, :]).astype(jnp.float32)
            * m_flat[None, :])                                 # (2,16) masked pooling
    rcT = refCov.reshape(BLL, REPR_IN).T                       # (53,128)

    data = jnp.zeros((DATA_ROWS, BLL), jnp.float32)
    data = data.at[0:BL, COL_X:COL_X + HIDDEN].set(x_flat)
    data = data.at[0:BL, COL_MASK:COL_MASK + BL].set(add_mask)
    data = data.at[0:B, COL_POOL:COL_POOL + BL].set(pool)
    data = data.at[BL:BL + REPR_IN, :].set(rcT)

    return pl.pallas_call(
        fused_forward_kernel,
        out_shape=jax.ShapeDtypeStruct((B, HIDDEN), jnp.float32),
        grid=(1,),
        in_specs=[pl.BlockSpec((DATA_ROWS, BLL), lambda i: (0, 0)),
                  pl.BlockSpec((PAR_ROWS, BLL), lambda i: (0, 0))],
        out_specs=pl.BlockSpec((B, HIDDEN), lambda i: (0, 0)),
        compiler_params=pltpu.CompilerParams(dimension_semantics=("arbitrary",)),
    )(data, param_slab)


# =====================================================================
# Glue (plain JAX): node-feature padding, parameter setup / packing
# =====================================================================
def process_node_feature(x_nodes, mask):
    """output[b, :len_b] = x_nodes[start_b : start_b + len_b]  (rest zeros)."""
    # TODO(synk): ragged scatter stays in plain JAX (data-dependent gather).
    lengths = mask.sum(axis=1)
    starts = jnp.cumsum(lengths) - lengths
    l_idx = jnp.arange(mask.shape[1])
    idx = starts[:, None] + l_idx[None, :]
    valid = l_idx[None, :] < lengths[:, None]
    idx = jnp.where(valid, idx, 0)
    return x_nodes[idx] * valid[..., None].astype(x_nodes.dtype)


def _linear_init(key, din, dout):
    kw, kb = jax.random.split(key)
    bound = 1.0 / (din ** 0.5)
    w = jax.random.uniform(kw, (din, dout), jnp.float32, -bound, bound)
    b = jax.random.uniform(kb, (1, dout), jnp.float32, -bound, bound)
    return w, b


def init_params(key, num_layers):
    layers = []
    lkeys = jax.random.split(key, num_layers)
    for li in range(num_layers):
        k = jax.random.split(lkeys[li], 6)
        p = {}
        p['wq'], p['bq'] = _linear_init(k[0], HIDDEN, HIDDEN)
        p['wk'], p['bk'] = _linear_init(k[1], HIDDEN, HIDDEN)
        p['wv'], p['bv'] = _linear_init(k[2], HIDDEN, HIDDEN)
        p['wo'], p['bo'] = _linear_init(k[3], HIDDEN, HIDDEN)
        p['rw1'], p['rb1'] = _linear_init(k[4], REPR_IN, REPR_HID)
        p['rw2'], p['rb2'] = _linear_init(k[5], REPR_HID, HEADS)
        p['gamma'] = jnp.ones((1, HIDDEN), jnp.float32)
        p['beta'] = jnp.zeros((1, HIDDEN), jnp.float32)
        layers.append(p)
    final = {'gamma': jnp.ones((1, HIDDEN), jnp.float32),
             'beta': jnp.zeros((1, HIDDEN), jnp.float32)}
    return {'layers': layers, 'final': final}


def pack_params(params):
    """One-time packing of all weights + gather constants into one (248,128) slab."""
    # gather constants for the block-diagonal ref-logit assembly:
    #   S[p, f]  = 1  iff  f // L == p                (row selection)
    #   GT[q, f] = 1  iff  (f // (L*L)) * L + f % L == q   (column gather, transposed)
    f = jnp.arange(BLL)
    p_idx = jnp.arange(BL)
    S = (f[None, :] // L == p_idx[:, None]).astype(jnp.float32)
    col_of_f = (f // (L * L)) * L + (f % L)
    GT = (col_of_f[None, :] == p_idx[:, None]).astype(jnp.float32)

    scale = 1.0 / (D_K ** 0.5)
    slab = jnp.zeros((PAR_ROWS, BLL), jnp.float32)
    slab = slab.at[ROW_S:ROW_S + BL, :].set(S)
    slab = slab.at[ROW_GT:ROW_GT + BL, :].set(GT)
    for ly, p in enumerate(params['layers']):
        base = ROW_LAYER0 + ly * LAYER_ROWS
        wqkv = jnp.concatenate([p['wq'] * scale, p['wk'], p['wv']], axis=1)   # (32,96)
        bqkv = jnp.concatenate([p['bq'] * scale, p['bk'], p['bv']], axis=1)   # (1,96)
        slab = slab.at[base + OFF_WQKV:base + OFF_WQKV + HIDDEN, 0:3 * HIDDEN].set(wqkv)
        slab = slab.at[base + OFF_WO:base + OFF_WO + HIDDEN, 0:HIDDEN].set(p['wo'])
        slab = slab.at[base + OFF_RW1T:base + OFF_RW1T + REPR_HID, 0:REPR_IN].set(p['rw1'].T)
        slab = slab.at[base + OFF_RW1T:base + OFF_RW1T + REPR_HID,
                       REPR_PAD:REPR_PAD + 1].set(p['rb1'].reshape(REPR_HID, 1))
        slab = slab.at[base + OFF_SMALL + 0, 0:3 * HIDDEN].set(bqkv[0])
        slab = slab.at[base + OFF_SMALL + 1, 0:HIDDEN].set(p['bo'][0])
        slab = slab.at[base + OFF_SMALL + 2, 0:HIDDEN].set(p['gamma'][0])
        slab = slab.at[base + OFF_SMALL + 3, 0:HIDDEN].set(p['beta'][0])
        slab = slab.at[base + OFF_SMALL + 4:base + OFF_SMALL + 8, 0:REPR_HID].set(p['rw2'].T)
        slab = slab.at[base + OFF_SMALL + 4:base + OFF_SMALL + 8,
                       REPR_HID:REPR_HID + 1].set(p['rb2'].reshape(HEADS, 1))
    slab = slab.at[ROW_FINAL + 0, 0:HIDDEN].set(params['final']['gamma'][0])
    slab = slab.at[ROW_FINAL + 1, 0:HIDDEN].set(params['final']['beta'][0])
    return slab


# =====================================================================
# Pure-JAX reference (mirrors the PyTorch forward) for verification
# =====================================================================
def _ref_attention_block(x, mask_f, refCov, p):
    b_, l_, h = x.shape
    q = x @ p['wq'] + p['bq']
    k = x @ p['wk'] + p['bk']
    v = x @ p['wv'] + p['bv']

    def split(t):
        return t.reshape(b_, l_, HEADS, D_K).transpose(0, 2, 1, 3)

    q, k, v = split(q), split(k), split(v)
    scores = jnp.einsum('bhld,bhmd->bhlm', q, k) / (D_K ** 0.5)
    mask2d = mask_f[:, :, None] * mask_f[:, None, :]           # (B, L, L)
    row_valid = jnp.max(mask2d, axis=-1, keepdims=True) > 0.5  # (B, L, 1)

    def msoftmax(lg):
        msk = jnp.where(mask2d[:, None] > 0.5, lg, NEG_INF)
        msk = jnp.where(row_valid[:, None], msk, 0.0)
        mx = msk.max(-1, keepdims=True)
        e = jnp.exp(msk - mx)
        return e / e.sum(-1, keepdims=True)

    attn_w = msoftmax(scores)
    h1 = jax.nn.relu(refCov @ p['rw1'] + p['rb1'])
    rlog = (h1 @ p['rw2'] + p['rb2']).transpose(0, 3, 1, 2)
    ref_w = msoftmax(rlog)
    comb = attn_w + ref_w
    comb = comb / comb.sum(-1, keepdims=True)
    out = jnp.einsum('bhlm,bhmd->bhld', comb, v).transpose(0, 2, 1, 3).reshape(b_, l_, h)
    out = out @ p['wo'] + p['bo']
    y = x + out
    mean = y.mean(-1, keepdims=True)
    var = ((y - mean) ** 2).mean(-1, keepdims=True)
    return (y - mean) / jnp.sqrt(var + LN_EPS) * p['gamma'] + p['beta']


def stacked_attention_ref(x_nodes, mask, refCov, params):
    x = process_node_feature(x_nodes, mask)
    mask_f = mask.astype(jnp.float32)
    for p in params['layers']:
        x = _ref_attention_block(x, mask_f, refCov, p)
    g, b = params['final']['gamma'], params['final']['beta']
    mean = x.mean(-1, keepdims=True)
    var = ((x - mean) ** 2).mean(-1, keepdims=True)
    y = (x - mean) / jnp.sqrt(var + LN_EPS) * g + b
    return (y * mask_f[..., None]).sum(axis=1)


# =====================================================================
if __name__ == "__main__":
    key = jax.random.PRNGKey(0)
    k_x, k_ref, k_par = jax.random.split(key, 3)

    lengths = jnp.array([6, 8], dtype=jnp.int32)               # valid nodes / batch
    total = int(lengths.sum())
    x_nodes = jax.random.normal(k_x, (total, HIDDEN), jnp.float32)        # (14, 32)
    mask = (jnp.arange(L)[None, :] < lengths[:, None]).astype(jnp.int32)  # (2, 8)
    refCov = jax.random.normal(k_ref, (B, L, L, REPR_IN), jnp.float32)    # (2,8,8,53)
    params = init_params(k_par, NUM_LAYERS)
    param_slab = pack_params(params)

    out = stacked_attention_pallas(x_nodes, mask, refCov, param_slab)
    out = jax.block_until_ready(out)

    ref = stacked_attention_ref(x_nodes, mask, refCov, params)
    assert out.shape == (B, HIDDEN)
    err = float(jnp.max(jnp.abs(out - ref)))
    assert err < 2e-3, f"mismatch vs reference: {err}"
    print("KERNEL_OK")
</pallas_src>

<mosaic_0001>
module attributes {stable_mosaic.version = 11 : i64} {
  func.func @fused_forward_kernel(%arg0: i32, %arg1: memref<72x128xf32, #tpu.memory_space<vmem>>, %arg2: memref<248x128xf32, #tpu.memory_space<vmem>>, %arg3: memref<2x32xf32, #tpu.memory_space<vmem>>) attributes {dimension_semantics = [#tpu.dimension_semantics<arbitrary>], iteration_bounds = array<i64: 1>, scalar_prefetch = 0 : i64, scratch_operands = 0 : i64, tpu.core_type = #tpu.core_type<tc>, window_params = [{pipeline_mode = #tpu.pipeline_mode<synchronous>, transform_indices = @transform_0, window_bounds = array<i64: 72, 128>}, {pipeline_mode = #tpu.pipeline_mode<synchronous>, transform_indices = @transform_1, window_bounds = array<i64: 248, 128>}, {pipeline_mode = #tpu.pipeline_mode<synchronous>, transform_indices = @transform_2, window_bounds = array<i64: 2, 32>}]} {
    %c0 = arith.constant 0 : index
    %c0_0 = arith.constant 0 : index
    %0 = vector.load %arg1[%c0, %c0_0] : memref<72x128xf32, #tpu.memory_space<vmem>>, vector<16x128xf32>
    %1 = vector.extract_strided_slice %0 {offsets = [0, 0], sizes = [16, 32], strides = [1, 1]} : vector<16x128xf32> to vector<16x32xf32>
    %2 = vector.extract_strided_slice %0 {offsets = [0, 32], sizes = [16, 16], strides = [1, 1]} : vector<16x128xf32> to vector<16x16xf32>
    %3 = vector.extract_strided_slice %0 {offsets = [0, 48], sizes = [2, 16], strides = [1, 1]} : vector<16x128xf32> to vector<2x16xf32>
    %c16 = arith.constant 16 : index
    %c0_1 = arith.constant 0 : index
    %4 = vector.load %arg1[%c16, %c0_1] : memref<72x128xf32, #tpu.memory_space<vmem>>, vector<56x128xf32>
    %c0_2 = arith.constant 0 : index
    %c0_3 = arith.constant 0 : index
    %5 = vector.load %arg2[%c0_2, %c0_3] : memref<248x128xf32, #tpu.memory_space<vmem>>, vector<16x128xf32>
    %c16_4 = arith.constant 16 : index
    %c0_5 = arith.constant 0 : index
    %6 = vector.load %arg2[%c16_4, %c0_5] : memref<248x128xf32, #tpu.memory_space<vmem>>, vector<16x128xf32>
    %c32 = arith.constant 32 : index
    %c0_6 = arith.constant 0 : index
    %7 = vector.load %arg2[%c32, %c0_6] : memref<248x128xf32, #tpu.memory_space<vmem>>, vector<32x128xf32>
    %c64 = arith.constant 64 : index
    %c0_7 = arith.constant 0 : index
    %8 = vector.load %arg2[%c64, %c0_7] : memref<248x128xf32, #tpu.memory_space<vmem>>, vector<32x128xf32>
    %c96 = arith.constant 96 : index
    %c0_8 = arith.constant 0 : index
    %9 = vector.load %arg2[%c96, %c0_8] : memref<248x128xf32, #tpu.memory_space<vmem>>, vector<32x128xf32>
    %c128 = arith.constant 128 : index
    %c0_9 = arith.constant 0 : index
    %10 = vector.load %arg2[%c128, %c0_9] : memref<248x128xf32, #tpu.memory_space<vmem>>, vector<8x128xf32>
    %11 = vector.extract_strided_slice %7 {offsets = [0, 0], sizes = [32, 96], strides = [1, 1]} : vector<32x128xf32> to vector<32x96xf32>
    %12 = vector.extract_strided_slice %8 {offsets = [0, 0], sizes = [32, 32], strides = [1, 1]} : vector<32x128xf32> to vector<32x32xf32>
    %13 = vector.extract_strided_slice %9 {offsets = [0, 0], sizes = [32, 56], strides = [1, 1]} : vector<32x128xf32> to vector<32x56xf32>
    %14 = vector.extract_strided_slice %9 {offsets = [0, 56], sizes = [32, 1], strides = [1, 1]} : vector<32x128xf32> to vector<32x1xf32>
    %15 = vector.extract_strided_slice %10 {offsets = [0, 0], sizes = [1, 96], strides = [1, 1]} : vector<8x128xf32> to vector<1x96xf32>
    %16 = vector.extract_strided_slice %10 {offsets = [1, 0], sizes = [1, 32], strides = [1, 1]} : vector<8x128xf32> to vector<1x32xf32>
    %17 = vector.extract_strided_slice %10 {offsets = [2, 0], sizes = [1, 32], strides = [1, 1]} : vector<8x128xf32> to vector<1x32xf32>
    %18 = vector.extract_strided_slice %10 {offsets = [3, 0], sizes = [1, 32], strides = [1, 1]} : vector<8x128xf32> to vector<1x32xf32>
    %19 = vector.extract_strided_slice %10 {offsets = [4, 0], sizes = [4, 32], strides = [1, 1]} : vector<8x128xf32> to vector<4x32xf32>
    %20 = vector.extract_strided_slice %10 {offsets = [4, 32], sizes = [4, 1], strides = [1, 1]} : vector<8x128xf32> to vector<4x1xf32>
    %cst = arith.constant dense<0.000000e+00> : vector<32x128xf32>
    %21 = tpu.matmul %13, %4, %cst {dimension_numbers = #tpu.dot_dimension_numbers<[1], [0], [0], [1], [0, 0, 1, 1], [], []>} : vector<32x56xf32>, vector<56x128xf32>, vector<32x128xf32> -> vector<32x128xf32>
    %22 = vector.broadcast %14 : vector<32x1xf32> to vector<32x128xf32>
    %23 = arith.addf %21, %22 : vector<32x128xf32>
    %cst_10 = arith.constant 0.000000e+00 : f32
    %24 = vector.broadcast %cst_10 : f32 to vector<32x128xf32>
    %25 = arith.maximumf %23, %24 : vector<32x128xf32>
    %cst_11 = arith.constant dense<0.000000e+00> : vector<4x128xf32>
    %26 = tpu.matmul %19, %25, %cst_11 {dimension_numbers = #tpu.dot_dimension_numbers<[1], [0], [0], [1], [0, 0, 1, 1], [], []>} : vector<4x32xf32>, vector<32x128xf32>, vector<4x128xf32> -> vector<4x128xf32>
    %27 = vector.broadcast %20 : vector<4x1xf32> to vector<4x128xf32>
    %28 = arith.addf %26, %27 : vector<4x128xf32>
    %cst_12 = arith.constant dense<0.000000e+00> : vector<16x96xf32>
    %29 = tpu.matmul %1, %11, %cst_12 {dimension_numbers = #tpu.dot_dimension_numbers<[1], [0], [0], [1], [0, 0, 1, 1], [], []>} : vector<16x32xf32>, vector<32x96xf32>, vector<16x96xf32> -> vector<16x96xf32>
    %30 = vector.broadcast %15 : vector<1x96xf32> to vector<16x96xf32>
    %31 = arith.addf %29, %30 : vector<16x96xf32>
    %32 = vector.extract_strided_slice %31 {offsets = [0, 0], sizes = [16, 8], strides = [1, 1]} : vector<16x96xf32> to vector<16x8xf32>
    %33 = vector.extract_strided_slice %31 {offsets = [0, 32], sizes = [16, 8], strides = [1, 1]} : vector<16x96xf32> to vector<16x8xf32>
    %34 = vector.extract_strided_slice %31 {offsets = [0, 64], sizes = [16, 8], strides = [1, 1]} : vector<16x96xf32> to vector<16x8xf32>
    %cst_13 = arith.constant dense<0.000000e+00> : vector<16x16xf32>
    %35 = tpu.matmul %32, %33, %cst_13 {dimension_numbers = #tpu.dot_dimension_numbers<[1], [1], [0], [0], [0, 0, 1, 0], [], []>} : vector<16x8xf32>, vector<16x8xf32>, vector<16x16xf32> -> vector<16x16xf32>
    %36 = arith.addf %35, %2 : vector<16x16xf32>
    %cst_14 = arith.constant dense<0xFF800000> : vector<16xf32>
    %37 = vector.multi_reduction <maximumf>, %36, %cst_14 [1] : vector<16x16xf32> to vector<16xf32>
    %38 = vector.shape_cast %37 : vector<16xf32> to vector<16x1xf32>
    %39 = vector.broadcast %38 : vector<16x1xf32> to vector<16x16xf32>
    %40 = arith.subf %36, %39 : vector<16x16xf32>
    %41 = math.exp %40 : vector<16x16xf32>
    %cst_15 = arith.constant dense<0.000000e+00> : vector<16xf32>
    %42 = vector.multi_reduction <add>, %41, %cst_15 [1] : vector<16x16xf32> to vector<16xf32>
    %43 = vector.shape_cast %42 : vector<16xf32> to vector<16x1xf32>
    %44 = vector.broadcast %43 : vector<16x1xf32> to vector<16x16xf32>
    %45 = arith.divf %41, %44 : vector<16x16xf32>
    %46 = vector.extract_strided_slice %28 {offsets = [0, 0], sizes = [1, 128], strides = [1, 1]} : vector<4x128xf32> to vector<1x128xf32>
    %47 = vector.broadcast %46 : vector<1x128xf32> to vector<16x128xf32>
    %48 = arith.mulf %5, %47 : vector<16x128xf32>
    %cst_16 = arith.constant dense<0.000000e+00> : vector<16x16xf32>
    %49 = tpu.matmul %48, %6, %cst_16 {dimension_numbers = #tpu.dot_dimension_numbers<[1], [1], [0], [0], [0, 0, 1, 0], [], []>} : vector<16x128xf32>, vector<16x128xf32>, vector<16x16xf32> -> vector<16x16xf32>
    %50 = arith.addf %49, %2 : vector<16x16xf32>
    %cst_17 = arith.constant dense<0xFF800000> : vector<16xf32>
    %51 = vector.multi_reduction <maximumf>, %50, %cst_17 [1] : vector<16x16xf32> to vector<16xf32>
    %52 = vector.shape_cast %51 : vector<16xf32> to vector<16x1xf32>
    %53 = vector.broadcast %52 : vector<16x1xf32> to vector<16x16xf32>
    %54 = arith.subf %50, %53 : vector<16x16xf32>
    %55 = math.exp %54 : vector<16x16xf32>
    %cst_18 = arith.constant dense<0.000000e+00> : vector<16xf32>
    %56 = vector.multi_reduction <add>, %55, %cst_18 [1] : vector<16x16xf32> to vector<16xf32>
    %57 = vector.shape_cast %56 : vector<16xf32> to vector<16x1xf32>
    %58 = vector.broadcast %57 : vector<16x1xf32> to vector<16x16xf32>
    %59 = arith.divf %55, %58 : vector<16x16xf32>
    %60 = arith.addf %45, %59 : vector<16x16xf32>
    %cst_19 = arith.constant 5.000000e-01 : f32
    %61 = vector.broadcast %cst_19 : f32 to vector<16x16xf32>
    %62 = arith.mulf %60, %61 : vector<16x16xf32>
    %cst_20 = arith.constant dense<0.000000e+00> : vector<16x8xf32>
    %63 = tpu.matmul %62, %34, %cst_20 {dimension_numbers = #tpu.dot_dimension_numbers<[1], [0], [0], [1], [0, 0, 1, 1], [], []>} : vector<16x16xf32>, vector<16x8xf32>, vector<16x8xf32> -> vector<16x8xf32>
    %64 = vector.extract_strided_slice %31 {offsets = [0, 8], sizes = [16, 8], strides = [1, 1]} : vector<16x96xf32> to vector<16x8xf32>
    %65 = vector.extract_strided_slice %31 {offsets = [0, 40], sizes = [16, 8], strides = [1, 1]} : vector<16x96xf32> to vector<16x8xf32>
    %66 = vector.extract_strided_slice %31 {offsets = [0, 72], sizes = [16, 8], strides = [1, 1]} : vector<16x96xf32> to vector<16x8xf32>
    %cst_21 = arith.constant dense<0.000000e+00> : vector<16x16xf32>
    %67 = tpu.matmul %64, %65, %cst_21 {dimension_numbers = #tpu.dot_dimension_numbers<[1], [1], [0], [0], [0, 0, 1, 0], [], []>} : vector<16x8xf32>, vector<16x8xf32>, vector<16x16xf32> -> vector<16x16xf32>
    %68 = arith.addf %67, %2 : vector<16x16xf32>
    %cst_22 = arith.constant dense<0xFF800000> : vector<16xf32>
    %69 = vector.multi_reduction <maximumf>, %68, %cst_22 [1] : vector<16x16xf32> to vector<16xf32>
    %70 = vector.shape_cast %69 : vector<16xf32> to vector<16x1xf32>
    %71 = vector.broadcast %70 : vector<16x1xf32> to vector<16x16xf32>
    %72 = arith.subf %68, %71 : vector<16x16xf32>
    %73 = math.exp %72 : vector<16x16xf32>
    %cst_23 = arith.constant dense<0.000000e+00> : vector<16xf32>
    %74 = vector.multi_reduction <add>, %73, %cst_23 [1] : vector<16x16xf32> to vector<16xf32>
    %75 = vector.shape_cast %74 : vector<16xf32> to vector<16x1xf32>
    %76 = vector.broadcast %75 : vector<16x1xf32> to vector<16x16xf32>
    %77 = arith.divf %73, %76 : vector<16x16xf32>
    %78 = vector.extract_strided_slice %28 {offsets = [1, 0], sizes = [1, 128], strides = [1, 1]} : vector<4x128xf32> to vector<1x128xf32>
    %79 = vector.broadcast %78 : vector<1x128xf32> to vector<16x128xf32>
    %80 = arith.mulf %5, %79 : vector<16x128xf32>
    %cst_24 = arith.constant dense<0.000000e+00> : vector<16x16xf32>
    %81 = tpu.matmul %80, %6, %cst_24 {dimension_numbers = #tpu.dot_dimension_numbers<[1], [1], [0], [0], [0, 0, 1, 0], [], []>} : vector<16x128xf32>, vector<16x128xf32>, vector<16x16xf32> -> vector<16x16xf32>
    %82 = arith.addf %81, %2 : vector<16x16xf32>
    %cst_25 = arith.constant dense<0xFF800000> : vector<16xf32>
    %83 = vector.multi_reduction <maximumf>, %82, %cst_25 [1] : vector<16x16xf32> to vector<16xf32>
    %84 = vector.shape_cast %83 : vector<16xf32> to vector<16x1xf32>
    %85 = vector.broadcast %84 : vector<16x1xf32> to vector<16x16xf32>
    %86 = arith.subf %82, %85 : vector<16x16xf32>
    %87 = math.exp %86 : vector<16x16xf32>
    %cst_26 = arith.constant dense<0.000000e+00> : vector<16xf32>
    %88 = vector.multi_reduction <add>, %87, %cst_26 [1] : vector<16x16xf32> to vector<16xf32>
    %89 = vector.shape_cast %88 : vector<16xf32> to vector<16x1xf32>
    %90 = vector.broadcast %89 : vector<16x1xf32> to vector<16x16xf32>
    %91 = arith.divf %87, %90 : vector<16x16xf32>
    %92 = arith.addf %77, %91 : vector<16x16xf32>
    %cst_27 = arith.constant 5.000000e-01 : f32
    %93 = vector.broadcast %cst_27 : f32 to vector<16x16xf32>
    %94 = arith.mulf %92, %93 : vector<16x16xf32>
    %cst_28 = arith.constant dense<0.000000e+00> : vector<16x8xf32>
    %95 = tpu.matmul %94, %66, %cst_28 {dimension_numbers = #tpu.dot_dimension_numbers<[1], [0], [0], [1], [0, 0, 1, 1], [], []>} : vector<16x16xf32>, vector<16x8xf32>, vector<16x8xf32> -> vector<16x8xf32>
    %96 = vector.extract_strided_slice %31 {offsets = [0, 16], sizes = [16, 8], strides = [1, 1]} : vector<16x96xf32> to vector<16x8xf32>
    %97 = vector.extract_strided_slice %31 {offsets = [0, 48], sizes = [16, 8], strides = [1, 1]} : vector<16x96xf32> to vector<16x8xf32>
    %98 = vector.extract_strided_slice %31 {offsets = [0, 80], sizes = [16, 8], strides = [1, 1]} : vector<16x96xf32> to vector<16x8xf32>
    %cst_29 = arith.constant dense<0.000000e+00> : vector<16x16xf32>
    %99 = tpu.matmul %96, %97, %cst_29 {dimension_numbers = #tpu.dot_dimension_numbers<[1], [1], [0], [0], [0, 0, 1, 0], [], []>} : vector<16x8xf32>, vector<16x8xf32>, vector<16x16xf32> -> vector<16x16xf32>
    %100 = arith.addf %99, %2 : vector<16x16xf32>
    %cst_30 = arith.constant dense<0xFF800000> : vector<16xf32>
    %101 = vector.multi_reduction <maximumf>, %100, %cst_30 [1] : vector<16x16xf32> to vector<16xf32>
    %102 = vector.shape_cast %101 : vector<16xf32> to vector<16x1xf32>
    %103 = vector.broadcast %102 : vector<16x1xf32> to vector<16x16xf32>
    %104 = arith.subf %100, %103 : vector<16x16xf32>
    %105 = math.exp %104 : vector<16x16xf32>
    %cst_31 = arith.constant dense<0.000000e+00> : vector<16xf32>
    %106 = vector.multi_reduction <add>, %105, %cst_31 [1] : vector<16x16xf32> to vector<16xf32>
    %107 = vector.shape_cast %106 : vector<16xf32> to vector<16x1xf32>
    %108 = vector.broadcast %107 : vector<16x1xf32> to vector<16x16xf32>
    %109 = arith.divf %105, %108 : vector<16x16xf32>
    %110 = vector.extract_strided_slice %28 {offsets = [2, 0], sizes = [1, 128], strides = [1, 1]} : vector<4x128xf32> to vector<1x128xf32>
    %111 = vector.broadcast %110 : vector<1x128xf32> to vector<16x128xf32>
    %112 = arith.mulf %5, %111 : vector<16x128xf32>
    %cst_32 = arith.constant dense<0.000000e+00> : vector<16x16xf32>
    %113 = tpu.matmul %112, %6, %cst_32 {dimension_numbers = #tpu.dot_dimension_numbers<[1], [1], [0], [0], [0, 0, 1, 0], [], []>} : vector<16x128xf32>, vector<16x128xf32>, vector<16x16xf32> -> vector<16x16xf32>
    %114 = arith.addf %113, %2 : vector<16x16xf32>
    %cst_33 = arith.constant dense<0xFF800000> : vector<16xf32>
    %115 = vector.multi_reduction <maximumf>, %114, %cst_33 [1] : vector<16x16xf32> to vector<16xf32>
    %116 = vector.shape_cast %115 : vector<16xf32> to vector<16x1xf32>
    %117 = vector.broadcast %116 : vector<16x1xf32> to vector<16x16xf32>
    %118 = arith.subf %114, %117 : vector<16x16xf32>
    %119 = math.exp %118 : vector<16x16xf32>
    %cst_34 = arith.constant dense<0.000000e+00> : vector<16xf32>
    %120 = vector.multi_reduction <add>, %119, %cst_34 [1] : vector<16x16xf32> to vector<16xf32>
    %121 = vector.shape_cast %120 : vector<16xf32> to vector<16x1xf32>
    %122 = vector.broadcast %121 : vector<16x1xf32> to vector<16x16xf32>
    %123 = arith.divf %119, %122 : vector<16x16xf32>
    %124 = arith.addf %109, %123 : vector<16x16xf32>
    %cst_35 = arith.constant 5.000000e-01 : f32
    %125 = vector.broadcast %cst_35 : f32 to vector<16x16xf32>
    %126 = arith.mulf %124, %125 : vector<16x16xf32>
    %cst_36 = arith.constant dense<0.000000e+00> : vector<16x8xf32>
    %127 = tpu.matmul %126, %98, %cst_36 {dimension_numbers = #tpu.dot_dimension_numbers<[1], [0], [0], [1], [0, 0, 1, 1], [], []>} : vector<16x16xf32>, vector<16x8xf32>, vector<16x8xf32> -> vector<16x8xf32>
    %128 = vector.extract_strided_slice %31 {offsets = [0, 24], sizes = [16, 8], strides = [1, 1]} : vector<16x96xf32> to vector<16x8xf32>
    %129 = vector.extract_strided_slice %31 {offsets = [0, 56], sizes = [16, 8], strides = [1, 1]} : vector<16x96xf32> to vector<16x8xf32>
    %130 = vector.extract_strided_slice %31 {offsets = [0, 88], sizes = [16, 8], strides = [1, 1]} : vector<16x96xf32> to vector<16x8xf32>
    %cst_37 = arith.constant dense<0.000000e+00> : vector<16x16xf32>
    %131 = tpu.matmul %128, %129, %cst_37 {dimension_numbers = #tpu.dot_dimension_numbers<[1], [1], [0], [0], [0, 0, 1, 0], [], []>} : vector<16x8xf32>, vector<16x8xf32>, vector<16x16xf32> -> vector<16x16xf32>
    %132 = arith.addf %131, %2 : vector<16x16xf32>
    %cst_38 = arith.constant dense<0xFF800000> : vector<16xf32>
    %133 = vector.multi_reduction <maximumf>, %132, %cst_38 [1] : vector<16x16xf32> to vector<16xf32>
    %134 = vector.shape_cast %133 : vector<16xf32> to vector<16x1xf32>
    %135 = vector.broadcast %134 : vector<16x1xf32> to vector<16x16xf32>
    %136 = arith.subf %132, %135 : vector<16x16xf32>
    %137 = math.exp %136 : vector<16x16xf32>
    %cst_39 = arith.constant dense<0.000000e+00> : vector<16xf32>
    %138 = vector.multi_reduction <add>, %137, %cst_39 [1] : vector<16x16xf32> to vector<16xf32>
    %139 = vector.shape_cast %138 : vector<16xf32> to vector<16x1xf32>
    %140 = vector.broadcast %139 : vector<16x1xf32> to vector<16x16xf32>
    %141 = arith.divf %137, %140 : vector<16x16xf32>
    %142 = vector.extract_strided_slice %28 {offsets = [3, 0], sizes = [1, 128], strides = [1, 1]} : vector<4x128xf32> to vector<1x128xf32>
    %143 = vector.broadcast %142 : vector<1x128xf32> to vector<16x128xf32>
    %144 = arith.mulf %5, %143 : vector<16x128xf32>
    %cst_40 = arith.constant dense<0.000000e+00> : vector<16x16xf32>
    %145 = tpu.matmul %144, %6, %cst_40 {dimension_numbers = #tpu.dot_dimension_numbers<[1], [1], [0], [0], [0, 0, 1, 0], [], []>} : vector<16x128xf32>, vector<16x128xf32>, vector<16x16xf32> -> vector<16x16xf32>
    %146 = arith.addf %145, %2 : vector<16x16xf32>
    %cst_41 = arith.constant dense<0xFF800000> : vector<16xf32>
    %147 = vector.multi_reduction <maximumf>, %146, %cst_41 [1] : vector<16x16xf32> to vector<16xf32>
    %148 = vector.shape_cast %147 : vector<16xf32> to vector<16x1xf32>
    %149 = vector.broadcast %148 : vector<16x1xf32> to vector<16x16xf32>
    %150 = arith.subf %146, %149 : vector<16x16xf32>
    %151 = math.exp %150 : vector<16x16xf32>
    %cst_42 = arith.constant dense<0.000000e+00> : vector<16xf32>
    %152 = vector.multi_reduction <add>, %151, %cst_42 [1] : vector<16x16xf32> to vector<16xf32>
    %153 = vector.shape_cast %152 : vector<16xf32> to vector<16x1xf32>
    %154 = vector.broadcast %153 : vector<16x1xf32> to vector<16x16xf32>
    %155 = arith.divf %151, %154 : vector<16x16xf32>
    %156 = arith.addf %141, %155 : vector<16x16xf32>
    %cst_43 = arith.constant 5.000000e-01 : f32
    %157 = vector.broadcast %cst_43 : f32 to vector<16x16xf32>
    %158 = arith.mulf %156, %157 : vector<16x16xf32>
    %cst_44 = arith.constant dense<0.000000e+00> : vector<16x8xf32>
    %159 = tpu.matmul %158, %130, %cst_44 {dimension_numbers = #tpu.dot_dimension_numbers<[1], [0], [0], [1], [0, 0, 1, 1], [], []>} : vector<16x16xf32>, vector<16x8xf32>, vector<16x8xf32> -> vector<16x8xf32>
    %160 = tpu.concatenate %63, %95, %127, %159 in 1 : vector<16x8xf32>, vector<16x8xf32>, vector<16x8xf32>, vector<16x8xf32> -> vector<16x32xf32>
    %cst_45 = arith.constant dense<0.000000e+00> : vector<16x32xf32>
    %161 = tpu.matmul %160, %12, %cst_45 {dimension_numbers = #tpu.dot_dimension_numbers<[1], [0], [0], [1], [0, 0, 1, 1], [], []>} : vector<16x32xf32>, vector<32x32xf32>, vector<16x32xf32> -> vector<16x32xf32>
    %162 = vector.broadcast %16 : vector<1x32xf32> to vector<16x32xf32>
    %163 = arith.addf %161, %162 : vector<16x32xf32>
    %164 = arith.addf %1, %163 : vector<16x32xf32>
    %cst_46 = arith.constant dense<0.000000e+00> : vector<16xf32>
    %165 = vector.multi_reduction <add>, %164, %cst_46 [1] : vector<16x32xf32> to vector<16xf32>
    %166 = vector.shape_cast %165 : vector<16xf32> to vector<16x1xf32>
    %cst_47 = arith.constant 3.125000e-02 : f32
    %167 = vector.broadcast %cst_47 : f32 to vector<16x1xf32>
    %168 = arith.mulf %166, %167 : vector<16x1xf32>
    %169 = vector.broadcast %168 : vector<16x1xf32> to vector<16x32xf32>
    %170 = arith.subf %164, %169 : vector<16x32xf32>
    %171 = arith.mulf %170, %170 : vector<16x32xf32>
    %cst_48 = arith.constant dense<0.000000e+00> : vector<16xf32>
    %172 = vector.multi_reduction <add>, %171, %cst_48 [1] : vector<16x32xf32> to vector<16xf32>
    %173 = vector.shape_cast %172 : vector<16xf32> to vector<16x1xf32>
    %cst_49 = arith.constant 3.125000e-02 : f32
    %174 = vector.broadcast %cst_49 : f32 to vector<16x1xf32>
    %175 = arith.mulf %173, %174 : vector<16x1xf32>
    %cst_50 = arith.constant 9.99999974E-6 : f32
    %176 = vector.broadcast %cst_50 : f32 to vector<16x1xf32>
    %177 = arith.addf %175, %176 : vector<16x1xf32>
    %178 = math.rsqrt %177 : vector<16x1xf32>
    %179 = vector.broadcast %178 : vector<16x1xf32> to vector<16x32xf32>
    %180 = arith.mulf %170, %179 : vector<16x32xf32>
    %181 = vector.broadcast %17 : vector<1x32xf32> to vector<16x32xf32>
    %182 = arith.mulf %180, %181 : vector<16x32xf32>
    %183 = vector.broadcast %18 : vector<1x32xf32> to vector<16x32xf32>
    %184 = arith.addf %182, %183 : vector<16x32xf32>
    %c136 = arith.constant 136 : index
    %c0_51 = arith.constant 0 : index
    %185 = vector.load %arg2[%c136, %c0_51] : memref<248x128xf32, #tpu.memory_space<vmem>>, vector<32x128xf32>
    %c168 = arith.constant 168 : index
    %c0_52 = arith.constant 0 : index
    %186 = vector.load %arg2[%c168, %c0_52] : memref<248x128xf32, #tpu.memory_space<vmem>>, vector<32x128xf32>
    %c200 = arith.constant 200 : index
    %c0_53 = arith.constant 0 : index
    %187 = vector.load %arg2[%c200, %c0_53] : memref<248x128xf32, #tpu.memory_space<vmem>>, vector<32x128xf32>
    %c232 = arith.constant 232 : index
    %c0_54 = arith.constant 0 : index
    %188 = vector.load %arg2[%c232, %c0_54] : memref<248x128xf32, #tpu.memory_space<vmem>>, vector<8x128xf32>
    %189 = vector.extract_strided_slice %185 {offsets = [0, 0], sizes = [32, 96], strides = [1, 1]} : vector<32x128xf32> to vector<32x96xf32>
    %190 = vector.extract_strided_slice %186 {offsets = [0, 0], sizes = [32, 32], strides = [1, 1]} : vector<32x128xf32> to vector<32x32xf32>
    %191 = vector.extract_strided_slice %187 {offsets = [0, 0], sizes = [32, 56], strides = [1, 1]} : vector<32x128xf32> to vector<32x56xf32>
    %192 = vector.extract_strided_slice %187 {offsets = [0, 56], sizes = [32, 1], strides = [1, 1]} : vector<32x128xf32> to vector<32x1xf32>
    %193 = vector.extract_strided_slice %188 {offsets = [0, 0], sizes = [1, 96], strides = [1, 1]} : vector<8x128xf32> to vector<1x96xf32>
    %194 = vector.extract_strided_slice %188 {offsets = [1, 0], sizes = [1, 32], strides = [1, 1]} : vector<8x128xf32> to vector<1x32xf32>
    %195 = vector.extract_strided_slice %188 {offsets = [2, 0], sizes = [1, 32], strides = [1, 1]} : vector<8x128xf32> to vector<1x32xf32>
    %196 = vector.extract_strided_slice %188 {offsets = [3, 0], sizes = [1, 32], strides = [1, 1]} : vector<8x128xf32> to vector<1x32xf32>
    %197 = vector.extract_strided_slice %188 {offsets = [4, 0], sizes = [4, 32], strides = [1, 1]} : vector<8x128xf32> to vector<4x32xf32>
    %198 = vector.extract_strided_slice %188 {offsets = [4, 32], sizes = [4, 1], strides = [1, 1]} : vector<8x128xf32> to vector<4x1xf32>
    %cst_55 = arith.constant dense<0.000000e+00> : vector<32x128xf32>
    %199 = tpu.matmul %191, %4, %cst_55 {dimension_numbers = #tpu.dot_dimension_numbers<[1], [0], [0], [1], [0, 0, 1, 1], [], []>} : vector<32x56xf32>, vector<56x128xf32>, vector<32x128xf32> -> vector<32x128xf32>
    %200 = vector.broadcast %192 : vector<32x1xf32> to vector<32x128xf32>
    %201 = arith.addf %199, %200 : vector<32x128xf32>
    %cst_56 = arith.constant 0.000000e+00 : f32
    %202 = vector.broadcast %cst_56 : f32 to vector<32x128xf32>
    %203 = arith.maximumf %201, %202 : vector<32x128xf32>
    %cst_57 = arith.constant dense<0.000000e+00> : vector<4x128xf32>
    %204 = tpu.matmul %197, %203, %cst_57 {dimension_numbers = #tpu.dot_dimension_numbers<[1], [0], [0], [1], [0, 0, 1, 1], [], []>} : vector<4x32xf32>, vector<32x128xf32>, vector<4x128xf32> -> vector<4x128xf32>
    %205 = vector.broadcast %198 : vector<4x1xf32> to vector<4x128xf32>
    %206 = arith.addf %204, %205 : vector<4x128xf32>
    %cst_58 = arith.constant dense<0.000000e+00> : vector<16x96xf32>
    %207 = tpu.matmul %184, %189, %cst_58 {dimension_numbers = #tpu.dot_dimension_numbers<[1], [0], [0], [1], [0, 0, 1, 1], [], []>} : vector<16x32xf32>, vector<32x96xf32>, vector<16x96xf32> -> vector<16x96xf32>
    %208 = vector.broadcast %193 : vector<1x96xf32> to vector<16x96xf32>
    %209 = arith.addf %207, %208 : vector<16x96xf32>
    %210 = vector.extract_strided_slice %209 {offsets = [0, 0], sizes = [16, 8], strides = [1, 1]} : vector<16x96xf32> to vector<16x8xf32>
    %211 = vector.extract_strided_slice %209 {offsets = [0, 32], sizes = [16, 8], strides = [1, 1]} : vector<16x96xf32> to vector<16x8xf32>
    %212 = vector.extract_strided_slice %209 {offsets = [0, 64], sizes = [16, 8], strides = [1, 1]} : vector<16x96xf32> to vector<16x8xf32>
    %cst_59 = arith.constant dense<0.000000e+00> : vector<16x16xf32>
    %213 = tpu.matmul %210, %211, %cst_59 {dimension_numbers = #tpu.dot_dimension_numbers<[1], [1], [0], [0], [0, 0, 1, 0], [], []>} : vector<16x8xf32>, vector<16x8xf32>, vector<16x16xf32> -> vector<16x16xf32>
    %214 = arith.addf %213, %2 : vector<16x16xf32>
    %cst_60 = arith.constant dense<0xFF800000> : vector<16xf32>
    %215 = vector.multi_reduction <maximumf>, %214, %cst_60 [1] : vector<16x16xf32> to vector<16xf32>
    %216 = vector.shape_cast %215 : vector<16xf32> to vector<16x1xf32>
    %217 = vector.broadcast %216 : vector<16x1xf32> to vector<16x16xf32>
    %218 = arith.subf %214, %217 : vector<16x16xf32>
    %219 = math.exp %218 : vector<16x16xf32>
    %cst_61 = arith.constant dense<0.000000e+00> : vector<16xf32>
    %220 = vector.multi_reduction <add>, %219, %cst_61 [1] : vector<16x16xf32> to vector<16xf32>
    %221 = vector.shape_cast %220 : vector<16xf32> to vector<16x1xf32>
    %222 = vector.broadcast %221 : vector<16x1xf32> to vector<16x16xf32>
    %223 = arith.divf %219, %222 : vector<16x16xf32>
    %224 = vector.extract_strided_slice %206 {offsets = [0, 0], sizes = [1, 128], strides = [1, 1]} : vector<4x128xf32> to vector<1x128xf32>
    %225 = vector.broadcast %224 : vector<1x128xf32> to vector<16x128xf32>
    %226 = arith.mulf %5, %225 : vector<16x128xf32>
    %cst_62 = arith.constant dense<0.000000e+00> : vector<16x16xf32>
    %227 = tpu.matmul %226, %6, %cst_62 {dimension_numbers = #tpu.dot_dimension_numbers<[1], [1], [0], [0], [0, 0, 1, 0], [], []>} : vector<16x128xf32>, vector<16x128xf32>, vector<16x16xf32> -> vector<16x16xf32>
    %228 = arith.addf %227, %2 : vector<16x16xf32>
    %cst_63 = arith.constant dense<0xFF800000> : vector<16xf32>
    %229 = vector.multi_reduction <maximumf>, %228, %cst_63 [1] : vector<16x16xf32> to vector<16xf32>
    %230 = vector.shape_cast %229 : vector<16xf32> to vector<16x1xf32>
    %231 = vector.broadcast %230 : vector<16x1xf32> to vector<16x16xf32>
    %232 = arith.subf %228, %231 : vector<16x16xf32>
    %233 = math.exp %232 : vector<16x16xf32>
    %cst_64 = arith.constant dense<0.000000e+00> : vector<16xf32>
    %234 = vector.multi_reduction <add>, %233, %cst_64 [1] : vector<16x16xf32> to vector<16xf32>
    %235 = vector.shape_cast %234 : vector<16xf32> to vector<16x1xf32>
    %236 = vector.broadcast %235 : vector<16x1xf32> to vector<16x16xf32>
    %237 = arith.divf %233, %236 : vector<16x16xf32>
    %238 = arith.addf %223, %237 : vector<16x16xf32>
    %cst_65 = arith.constant 5.000000e-01 : f32
    %239 = vector.broadcast %cst_65 : f32 to vector<16x16xf32>
    %240 = arith.mulf %238, %239 : vector<16x16xf32>
    %cst_66 = arith.constant dense<0.000000e+00> : vector<16x8xf32>
    %241 = tpu.matmul %240, %212, %cst_66 {dimension_numbers = #tpu.dot_dimension_numbers<[1], [0], [0], [1], [0, 0, 1, 1], [], []>} : vector<16x16xf32>, vector<16x8xf32>, vector<16x8xf32> -> vector<16x8xf32>
    %242 = vector.extract_strided_slice %209 {offsets = [0, 8], sizes = [16, 8], strides = [1, 1]} : vector<16x96xf32> to vector<16x8xf32>
    %243 = vector.extract_strided_slice %209 {offsets = [0, 40], sizes = [16, 8], strides = [1, 1]} : vector<16x96xf32> to vector<16x8xf32>
    %244 = vector.extract_strided_slice %209 {offsets = [0, 72], sizes = [16, 8], strides = [1, 1]} : vector<16x96xf32> to vector<16x8xf32>
    %cst_67 = arith.constant dense<0.000000e+00> : vector<16x16xf32>
    %245 = tpu.matmul %242, %243, %cst_67 {dimension_numbers = #tpu.dot_dimension_numbers<[1], [1], [0], [0], [0, 0, 1, 0], [], []>} : vector<16x8xf32>, vector<16x8xf32>, vector<16x16xf32> -> vector<16x16xf32>
    %246 = arith.addf %245, %2 : vector<16x16xf32>
    %cst_68 = arith.constant dense<0xFF800000> : vector<16xf32>
    %247 = vector.multi_reduction <maximumf>, %246, %cst_68 [1] : vector<16x16xf32> to vector<16xf32>
    %248 = vector.shape_cast %247 : vector<16xf32> to vector<16x1xf32>
    %249 = vector.broadcast %248 : vector<16x1xf32> to vector<16x16xf32>
    %250 = arith.subf %246, %249 : vector<16x16xf32>
    %251 = math.exp %250 : vector<16x16xf32>
    %cst_69 = arith.constant dense<0.000000e+00> : vector<16xf32>
    %252 = vector.multi_reduction <add>, %251, %cst_69 [1] : vector<16x16xf32> to vector<16xf32>
    %253 = vector.shape_cast %252 : vector<16xf32> to vector<16x1xf32>
    %254 = vector.broadcast %253 : vector<16x1xf32> to vector<16x16xf32>
    %255 = arith.divf %251, %254 : vector<16x16xf32>
    %256 = vector.extract_strided_slice %206 {offsets = [1, 0], sizes = [1, 128], strides = [1, 1]} : vector<4x128xf32> to vector<1x128xf32>
    %257 = vector.broadcast %256 : vector<1x128xf32> to vector<16x128xf32>
    %258 = arith.mulf %5, %257 : vector<16x128xf32>
    %cst_70 = arith.constant dense<0.000000e+00> : vector<16x16xf32>
    %259 = tpu.matmul %258, %6, %cst_70 {dimension_numbers = #tpu.dot_dimension_numbers<[1], [1], [0], [0], [0, 0, 1, 0], [], []>} : vector<16x128xf32>, vector<16x128xf32>, vector<16x16xf32> -> vector<16x16xf32>
    %260 = arith.addf %259, %2 : vector<16x16xf32>
    %cst_71 = arith.constant dense<0xFF800000> : vector<16xf32>
    %261 = vector.multi_reduction <maximumf>, %260, %cst_71 [1] : vector<16x16xf32> to vector<16xf32>
    %262 = vector.shape_cast %261 : vector<16xf32> to vector<16x1xf32>
    %263 = vector.broadcast %262 : vector<16x1xf32> to vector<16x16xf32>
    %264 = arith.subf %260, %263 : vector<16x16xf32>
    %265 = math.exp %264 : vector<16x16xf32>
    %cst_72 = arith.constant dense<0.000000e+00> : vector<16xf32>
    %266 = vector.multi_reduction <add>, %265, %cst_72 [1] : vector<16x16xf32> to vector<16xf32>
    %267 = vector.shape_cast %266 : vector<16xf32> to vector<16x1xf32>
    %268 = vector.broadcast %267 : vector<16x1xf32> to vector<16x16xf32>
    %269 = arith.divf %265, %268 : vector<16x16xf32>
    %270 = arith.addf %255, %269 : vector<16x16xf32>
    %cst_73 = arith.constant 5.000000e-01 : f32
    %271 = vector.broadcast %cst_73 : f32 to vector<16x16xf32>
    %272 = arith.mulf %270, %271 : vector<16x16xf32>
    %cst_74 = arith.constant dense<0.000000e+00> : vector<16x8xf32>
    %273 = tpu.matmul %272, %244, %cst_74 {dimension_numbers = #tpu.dot_dimension_numbers<[1], [0], [0], [1], [0, 0, 1, 1], [], []>} : vector<16x16xf32>, vector<16x8xf32>, vector<16x8xf32> -> vector<16x8xf32>
    %274 = vector.extract_strided_slice %209 {offsets = [0, 16], sizes = [16, 8], strides = [1, 1]} : vector<16x96xf32> to vector<16x8xf32>
    %275 = vector.extract_strided_slice %209 {offsets = [0, 48], sizes = [16, 8], strides = [1, 1]} : vector<16x96xf32> to vector<16x8xf32>
    %276 = vector.extract_strided_slice %209 {offsets = [0, 80], sizes = [16, 8], strides = [1, 1]} : vector<16x96xf32> to vector<16x8xf32>
    %cst_75 = arith.constant dense<0.000000e+00> : vector<16x16xf32>
    %277 = tpu.matmul %274, %275, %cst_75 {dimension_numbers = #tpu.dot_dimension_numbers<[1], [1], [0], [0], [0, 0, 1, 0], [], []>} : vector<16x8xf32>, vector<16x8xf32>, vector<16x16xf32> -> vector<16x16xf32>
    %278 = arith.addf %277, %2 : vector<16x16xf32>
    %cst_76 = arith.constant dense<0xFF800000> : vector<16xf32>
    %279 = vector.multi_reduction <maximumf>, %278, %cst_76 [1] : vector<16x16xf32> to vector<16xf32>
    %280 = vector.shape_cast %279 : vector<16xf32> to vector<16x1xf32>
    %281 = vector.broadcast %280 : vector<16x1xf32> to vector<16x16xf32>
    %282 = arith.subf %278, %281 : vector<16x16xf32>
    %283 = math.exp %282 : vector<16x16xf32>
    %cst_77 = arith.constant dense<0.000000e+00> : vector<16xf32>
    %284 = vector.multi_reduction <add>, %283, %cst_77 [1] : vector<16x16xf32> to vector<16xf32>
    %285 = vector.shape_cast %284 : vector<16xf32> to vector<16x1xf32>
    %286 = vector.broadcast %285 : vector<16x1xf32> to vector<16x16xf32>
    %287 = arith.divf %283, %286 : vector<16x16xf32>
    %288 = vector.extract_strided_slice %206 {offsets = [2, 0], sizes = [1, 128], strides = [1, 1]} : vector<4x128xf32> to vector<1x128xf32>
    %289 = vector.broadcast %288 : vector<1x128xf32> to vector<16x128xf32>
    %290 = arith.mulf %5, %289 : vector<16x128xf32>
    %cst_78 = arith.constant dense<0.000000e+00> : vector<16x16xf32>
    %291 = tpu.matmul %290, %6, %cst_78 {dimension_numbers = #tpu.dot_dimension_numbers<[1], [1], [0], [0], [0, 0, 1, 0], [], []>} : vector<16x128xf32>, vector<16x128xf32>, vector<16x16xf32> -> vector<16x16xf32>
    %292 = arith.addf %291, %2 : vector<16x16xf32>
    %cst_79 = arith.constant dense<0xFF800000> : vector<16xf32>
    %293 = vector.multi_reduction <maximumf>, %292, %cst_79 [1] : vector<16x16xf32> to vector<16xf32>
    %294 = vector.shape_cast %293 : vector<16xf32> to vector<16x1xf32>
    %295 = vector.broadcast %294 : vector<16x1xf32> to vector<16x16xf32>
    %296 = arith.subf %292, %295 : vector<16x16xf32>
    %297 = math.exp %296 : vector<16x16xf32>
    %cst_80 = arith.constant dense<0.000000e+00> : vector<16xf32>
    %298 = vector.multi_reduction <add>, %297, %cst_80 [1] : vector<16x16xf32> to vector<16xf32>
    %299 = vector.shape_cast %298 : vector<16xf32> to vector<16x1xf32>
    %300 = vector.broadcast %299 : vector<16x1xf32> to vector<16x16xf32>
    %301 = arith.divf %297, %300 : vector<16x16xf32>
    %302 = arith.addf %287, %301 : vector<16x16xf32>
    %cst_81 = arith.constant 5.000000e-01 : f32
    %303 = vector.broadcast %cst_81 : f32 to vector<16x16xf32>
    %304 = arith.mulf %302, %303 : vector<16x16xf32>
    %cst_82 = arith.constant dense<0.000000e+00> : vector<16x8xf32>
    %305 = tpu.matmul %304, %276, %cst_82 {dimension_numbers = #tpu.dot_dimension_numbers<[1], [0], [0], [1], [0, 0, 1, 1], [], []>} : vector<16x16xf32>, vector<16x8xf32>, vector<16x8xf32> -> vector<16x8xf32>
    %306 = vector.extract_strided_slice %209 {offsets = [0, 24], sizes = [16, 8], strides = [1, 1]} : vector<16x96xf32> to vector<16x8xf32>
    %307 = vector.extract_strided_slice %209 {offsets = [0, 56], sizes = [16, 8], strides = [1, 1]} : vector<16x96xf32> to vector<16x8xf32>
    %308 = vector.extract_strided_slice %209 {offsets = [0, 88], sizes = [16, 8], strides = [1, 1]} : vector<16x96xf32> to vector<16x8xf32>
    %cst_83 = arith.constant dense<0.000000e+00> : vector<16x16xf32>
    %309 = tpu.matmul %306, %307, %cst_83 {dimension_numbers = #tpu.dot_dimension_numbers<[1], [1], [0], [0], [0, 0, 1, 0], [], []>} : vector<16x8xf32>, vector<16x8xf32>, vector<16x16xf32> -> vector<16x16xf32>
    %310 = arith.addf %309, %2 : vector<16x16xf32>
    %cst_84 = arith.constant dense<0xFF800000> : vector<16xf32>
    %311 = vector.multi_reduction <maximumf>, %310, %cst_84 [1] : vector<16x16xf32> to vector<16xf32>
    %312 = vector.shape_cast %311 : vector<16xf32> to vector<16x1xf32>
    %313 = vector.broadcast %312 : vector<16x1xf32> to vector<16x16xf32>
    %314 = arith.subf %310, %313 : vector<16x16xf32>
    %315 = math.exp %314 : vector<16x16xf32>
    %cst_85 = arith.constant dense<0.000000e+00> : vector<16xf32>
    %316 = vector.multi_reduction <add>, %315, %cst_85 [1] : vector<16x16xf32> to vector<16xf32>
    %317 = vector.shape_cast %316 : vector<16xf32> to vector<16x1xf32>
    %318 = vector.broadcast %317 : vector<16x1xf32> to vector<16x16xf32>
    %319 = arith.divf %315, %318 : vector<16x16xf32>
    %320 = vector.extract_strided_slice %206 {offsets = [3, 0], sizes = [1, 128], strides = [1, 1]} : vector<4x128xf32> to vector<1x128xf32>
    %321 = vector.broadcast %320 : vector<1x128xf32> to vector<16x128xf32>
    %322 = arith.mulf %5, %321 : vector<16x128xf32>
    %cst_86 = arith.constant dense<0.000000e+00> : vector<16x16xf32>
    %323 = tpu.matmul %322, %6, %cst_86 {dimension_numbers = #tpu.dot_dimension_numbers<[1], [1], [0], [0], [0, 0, 1, 0], [], []>} : vector<16x128xf32>, vector<16x128xf32>, vector<16x16xf32> -> vector<16x16xf32>
    %324 = arith.addf %323, %2 : vector<16x16xf32>
    %cst_87 = arith.constant dense<0xFF800000> : vector<16xf32>
    %325 = vector.multi_reduction <maximumf>, %324, %cst_87 [1] : vector<16x16xf32> to vector<16xf32>
    %326 = vector.shape_cast %325 : vector<16xf32> to vector<16x1xf32>
    %327 = vector.broadcast %326 : vector<16x1xf32> to vector<16x16xf32>
    %328 = arith.subf %324, %327 : vector<16x16xf32>
    %329 = math.exp %328 : vector<16x16xf32>
    %cst_88 = arith.constant dense<0.000000e+00> : vector<16xf32>
    %330 = vector.multi_reduction <add>, %329, %cst_88 [1] : vector<16x16xf32> to vector<16xf32>
    %331 = vector.shape_cast %330 : vector<16xf32> to vector<16x1xf32>
    %332 = vector.broadcast %331 : vector<16x1xf32> to vector<16x16xf32>
    %333 = arith.divf %329, %332 : vector<16x16xf32>
    %334 = arith.addf %319, %333 : vector<16x16xf32>
    %cst_89 = arith.constant 5.000000e-01 : f32
    %335 = vector.broadcast %cst_89 : f32 to vector<16x16xf32>
    %336 = arith.mulf %334, %335 : vector<16x16xf32>
    %cst_90 = arith.constant dense<0.000000e+00> : vector<16x8xf32>
    %337 = tpu.matmul %336, %308, %cst_90 {dimension_numbers = #tpu.dot_dimension_numbers<[1], [0], [0], [1], [0, 0, 1, 1], [], []>} : vector<16x16xf32>, vector<16x8xf32>, vector<16x8xf32> -> vector<16x8xf32>
    %338 = tpu.concatenate %241, %273, %305, %337 in 1 : vector<16x8xf32>, vector<16x8xf32>, vector<16x8xf32>, vector<16x8xf32> -> vector<16x32xf32>
    %cst_91 = arith.constant dense<0.000000e+00> : vector<16x32xf32>
    %339 = tpu.matmul %338, %190, %cst_91 {dimension_numbers = #tpu.dot_dimension_numbers<[1], [0], [0], [1], [0, 0, 1, 1], [], []>} : vector<16x32xf32>, vector<32x32xf32>, vector<16x32xf32> -> vector<16x32xf32>
    %340 = vector.broadcast %194 : vector<1x32xf32> to vector<16x32xf32>
    %341 = arith.addf %339, %340 : vector<16x32xf32>
    %342 = arith.addf %184, %341 : vector<16x32xf32>
    %cst_92 = arith.constant dense<0.000000e+00> : vector<16xf32>
    %343 = vector.multi_reduction <add>, %342, %cst_92 [1] : vector<16x32xf32> to vector<16xf32>
    %344 = vector.shape_cast %343 : vector<16xf32> to vector<16x1xf32>
    %cst_93 = arith.constant 3.125000e-02 : f32
    %345 = vector.broadcast %cst_93 : f32 to vector<16x1xf32>
    %346 = arith.mulf %344, %345 : vector<16x1xf32>
    %347 = vector.broadcast %346 : vector<16x1xf32> to vector<16x32xf32>
    %348 = arith.subf %342, %347 : vector<16x32xf32>
    %349 = arith.mulf %348, %348 : vector<16x32xf32>
    %cst_94 = arith.constant dense<0.000000e+00> : vector<16xf32>
    %350 = vector.multi_reduction <add>, %349, %cst_94 [1] : vector<16x32xf32> to vector<16xf32>
    %351 = vector.shape_cast %350 : vector<16xf32> to vector<16x1xf32>
    %cst_95 = arith.constant 3.125000e-02 : f32
    %352 = vector.broadcast %cst_95 : f32 to vector<16x1xf32>
    %353 = arith.mulf %351, %352 : vector<16x1xf32>
    %cst_96 = arith.constant 9.99999974E-6 : f32
    %354 = vector.broadcast %cst_96 : f32 to vector<16x1xf32>
    %355 = arith.addf %353, %354 : vector<16x1xf32>
    %356 = math.rsqrt %355 : vector<16x1xf32>
    %357 = vector.broadcast %356 : vector<16x1xf32> to vector<16x32xf32>
    %358 = arith.mulf %348, %357 : vector<16x32xf32>
    %359 = vector.broadcast %195 : vector<1x32xf32> to vector<16x32xf32>
    %360 = arith.mulf %358, %359 : vector<16x32xf32>
    %361 = vector.broadcast %196 : vector<1x32xf32> to vector<16x32xf32>
    %362 = arith.addf %360, %361 : vector<16x32xf32>
    %c240 = arith.constant 240 : index
    %c0_97 = arith.constant 0 : index
    %363 = vector.load %arg2[%c240, %c0_97] : memref<248x128xf32, #tpu.memory_space<vmem>>, vector<8x128xf32>
    %364 = vector.extract_strided_slice %363 {offsets = [0, 0], sizes = [1, 32], strides = [1, 1]} : vector<8x128xf32> to vector<1x32xf32>
    %365 = vector.extract_strided_slice %363 {offsets = [1, 0], sizes = [1, 32], strides = [1, 1]} : vector<8x128xf32> to vector<1x32xf32>
    %cst_98 = arith.constant dense<0.000000e+00> : vector<16xf32>
    %366 = vector.multi_reduction <add>, %362, %cst_98 [1] : vector<16x32xf32> to vector<16xf32>
    %367 = vector.shape_cast %366 : vector<16xf32> to vector<16x1xf32>
    %cst_99 = arith.constant 3.125000e-02 : f32
    %368 = vector.broadcast %cst_99 : f32 to vector<16x1xf32>
    %369 = arith.mulf %367, %368 : vector<16x1xf32>
    %370 = vector.broadcast %369 : vector<16x1xf32> to vector<16x32xf32>
    %371 = arith.subf %362, %370 : vector<16x32xf32>
    %372 = arith.mulf %371, %371 : vector<16x32xf32>
    %cst_100 = arith.constant dense<0.000000e+00> : vector<16xf32>
    %373 = vector.multi_reduction <add>, %372, %cst_100 [1] : vector<16x32xf32> to vector<16xf32>
    %374 = vector.shape_cast %373 : vector<16xf32> to vector<16x1xf32>
    %cst_101 = arith.constant 3.125000e-02 : f32
    %375 = vector.broadcast %cst_101 : f32 to vector<16x1xf32>
    %376 = arith.mulf %374, %375 : vector<16x1xf32>
    %cst_102 = arith.constant 9.99999974E-6 : f32
    %377 = vector.broadcast %cst_102 : f32 to vector<16x1xf32>
    %378 = arith.addf %376, %377 : vector<16x1xf32>
    %379 = math.rsqrt %378 : vector<16x1xf32>
    %380 = vector.broadcast %379 : vector<16x1xf32> to vector<16x32xf32>
    %381 = arith.mulf %371, %380 : vector<16x32xf32>
    %382 = vector.broadcast %364 : vector<1x32xf32> to vector<16x32xf32>
    %383 = arith.mulf %381, %382 : vector<16x32xf32>
    %384 = vector.broadcast %365 : vector<1x32xf32> to vector<16x32xf32>
    %385 = arith.addf %383, %384 : vector<16x32xf32>
    %cst_103 = arith.constant dense<0.000000e+00> : vector<2x32xf32>
    %386 = tpu.matmul %3, %385, %cst_103 {dimension_numbers = #tpu.dot_dimension_numbers<[1], [0], [0], [1], [0, 0, 1, 1], [], []>} : vector<2x16xf32>, vector<16x32xf32>, vector<2x32xf32> -> vector<2x32xf32>
    %c0_104 = arith.constant 0 : index
    %c0_105 = arith.constant 0 : index
    %387 = vector.load %arg3[%c0_104, %c0_105] : memref<2x32xf32, #tpu.memory_space<vmem>>, vector<2x32xf32>
    tpu.vector_store %arg3[%c0_104, %c0_105], %386 {strides = array<i32>} : memref<2x32xf32, #tpu.memory_space<vmem>>, vector<2x32xf32>,
    return
  }
  func.func @transform_0(%arg0: i32) -> (i32, i32) {
    %c0_i32 = arith.constant 0 : i32
    %c0_i32_0 = arith.constant 0 : i32
    %c0_i32_1 = arith.constant 0 : i32
    return %c0_i32, %c0_i32_0 : i32, i32
  }
  func.func @transform_1(%arg0: i32) -> (i32, i32) {
    %c0_i32 = arith.constant 0 : i32
    %c0_i32_0 = arith.constant 0 : i32
    %c0_i32_1 = arith.constant 0 : i32
    return %c0_i32, %c0_i32_0 : i32, i32
  }
  func.func @transform_2(%arg0: i32) -> (i32, i32) {
    %c0_i32 = arith.constant 0 : i32
    %c0_i32_0 = arith.constant 0 : i32
    %c0_i32_1 = arith.constant 0 : i32
    return %c0_i32, %c0_i32_0 : i32, i32
  }
}

</mosaic_0001>

<bundles_post_ra>
// kernel: eq.15
= control target key start
LH: loop header
LB: loop body
LE: loop exit
PB: predicated region body
PF: predicated region fallthrough
CT: control target
= control target key end

     0   :  { %vm7_vm0 = vcmask 64512   ;;  %vm13_vm1 = vcmask 130112   ;;  %s39_s0 = inlined_call_operand.vmem [shape: s32[2,8], index: 0, kind: input, shape index: {}]   ;;  %s40_s1 = inlined_call_operand.vmem [shape: s32[16], index: 1, kind: output, shape index: {}]  }
   0x1   :  { %v4_v0 = vld [vmem:[%s39_s0] sm:$0x3]  ;;  %s22_s0 = smov 8  }
   0x2   :  { %5 = vst [vmem:[#allocation1] sm:$0x3] %v4_v0 }
   0x9   :  { %v10_v1 = vld [vmem:[#allocation1 + $0x1] sm:$0x1]   ;;  %v6_v2 = vld [vmem:[#allocation1] sm:$0x1]  }
   0xa   :  { %11 = vrot.lane.b32.xlu0 %v10_v1, %s22_s0  ;;  %8 = vst.msk [vmem:[#allocation0] sm:$0x1] %vm7_vm0, %v6_v2  }
  0x7c   :  { %v12_v3 = vpop.permute.xlu0 %11  }
  0x7d   :  { %14 = vst.msk [vmem:[#allocation0] sm:$0x1] %vm13_vm1, %v12_v3  }
  0x84   :  { %v18_v4 = vld [vmem:[#allocation0] sm:$0x1] }
  0x85   :  { %20 = vst [vmem:[%s40_s1] sm:$0x1] %v18_v4 }

// kernel: mul.21
= control target key start
LH: loop header
LB: loop body
LE: loop exit
PB: predicated region body
PF: predicated region fallthrough
CT: control target
= control target key end

     0   :  { %vm7_vm0 = vcmask 64512   ;;  %vm13_vm1 = vcmask 130112   ;;  %s39_s0 = inlined_call_operand.vmem [shape: f32[2,8], index: 0, kind: input, shape index: {}]   ;;  %s40_s1 = inlined_call_operand.vmem [shape: f32[16], index: 1, kind: output, shape index: {}]  }
   0x1   :  { %v4_v0 = vld [vmem:[%s39_s0] sm:$0x3]  ;;  %s22_s0 = smov 8  }
   0x2   :  { %5 = vst [vmem:[#allocation1] sm:$0x3] %v4_v0 }
   0x9   :  { %v10_v1 = vld [vmem:[#allocation1 + $0x1] sm:$0x1]   ;;  %v6_v2 = vld [vmem:[#allocation1] sm:$0x1]  }
   0xa   :  { %11 = vrot.lane.b32.xlu0 %v10_v1, %s22_s0  ;;  %8 = vst.msk [vmem:[#allocation0] sm:$0x1] %vm7_vm0, %v6_v2  }
  0x7c   :  { %v12_v3 = vpop.permute.xlu0 %11  }
  0x7d   :  { %14 = vst.msk [vmem:[#allocation0] sm:$0x1] %vm13_vm1, %v12_v3  }
  0x84   :  { %v18_v4 = vld [vmem:[#allocation0] sm:$0x1] }
  0x85   :  { %20 = vst [vmem:[%s40_s1] sm:$0x1] %v18_v4 }

// kernel: stacked_attention_pallas.1
= control target key start
LH: loop header
LB: loop body
LE: loop exit
PB: predicated region body
PF: predicated region fallthrough
CT: control target
= control target key end

     0   :  { %vm58_vm0 = vcmask 457728   ;;  %v4475_v5 = vmov 56   ;;  %s5144_s0 = inlined_call_operand.vmem [shape: f32[72,128], index: 0, kind: input, shape index: {}]   ;;  %s5145_s1 = inlined_call_operand.vmem [shape: f32[248,128], index: 1, kind: input, shape index: {}]   ;;  %s5146_s2 = inlined_call_operand.hbm [shape: f32[2,32], index: 2, kind: output, shape index: {}]  }
   0x1   :  { %v14_v0 = vld [vmem:[%s5144_s0 + $0x10] sm:$0xff]  ;;  %v15_v1 = vld [vmem:[%s5144_s0 + $0x18] sm:$0xff]  ;;  %v16_v2 = vld [vmem:[%s5144_s0 + $0x20] sm:$0xff]  ;;  %4221 = vset.pattern.permute.xlu0 %v4475_v5  ;;  %4222 = vset.pattern.permute.xlu1 %v4475_v5 }
   0x2   :  { %v4519_v3 = vpack.c.bf16 %v15_v1, %v14_v0  ;;  %v17_v4 = vld [vmem:[%s5144_s0 + $0x28] sm:$0xff]  ;;  %v18_v7 = vld [vmem:[%s5144_s0 + $0x30] sm:$0xff]  ;;  %v19_v8 = vld [vmem:[%s5144_s0 + $0x38] sm:$0xff] }
   0x3   :  { %v4524_v6 = vpack.c.bf16 %v17_v4, %v16_v2  ;;  %v33_v9 = vld [vmem:[%s5145_s1 + $0x60] sm:$0xff] }
   0x4   :  { %4019 = vmatprep.subr.bf16.mxu0 %v4519_v3  ;;  %3751 = vmatprep.mubr.msk.f32.mxu0 %vm58_vm0, %v33_v9 }
   0x5   :  { %7 = vsyncpa [#allocation3], 0  ;;  %4021 = vmatpush3.bf16.msra.mxu0 %v4519_v3  ;;  %v35_v10 = vld [vmem:[%s5145_s1 + $0x70] sm:$0xff]  ;;  %40 = vperm.xlu0 %4221, %v33_v9   ;;  %v4542_v11 = vpack.c.bf16 %v19_v8, %v18_v7  ;;  %v34_v12 = vld [vmem:[%s5145_s1 + $0x68] sm:$0xff]  ;;  %v4476_v15 = vmov 0.0|0.0   ;;  %vm4477_vm1 = vmmov 0   ;;  %v236_v49 = vlaneseq }
   0x6   :  { %4023 = vmatprep.subr.bf16.mxu0 %v4524_v6  ;;  %50 = vperm.xlu1 %4222, %v35_v10   ;;  %v36_v13 = vld [vmem:[%s5145_s1 + $0x78] sm:$0xff]  ;;  %v4555_v14 = vld [vmem:[%s5144_s0 + $0x40] sm:$0xff]  ;;  %v4478_v16 = vmov 0.0   ;;  %v4479_v18 = vmov 32   ;;  %v26_v35 = vld [vmem:[%s5145_s1 + $0x28] sm:$0xff]  ;;  %vm163_vm2 = vcmask 261120  }
   0x7   :  { %4030 = vmatprep.subr.bf16.mxu1 %v4476_v15  ;;  %3765 = vmatprep.mubr.msk.f32.mxu1 %vm4477_vm1, %v4478_v16  ;;  %v37_v17 = vld [vmem:[%s5145_s1 + $0x80] sm:$0xff]  ;;  %v27_v40 = vld [vmem:[%s5145_s1 + $0x30] sm:$0xff]  ;;  %v28_v41 = vld [vmem:[%s5145_s1 + $0x38] sm:$0xff]  ;;  %s4480_s21 = smov 96   ;;  %v4610_v51 = vshrl.u32 %v236_v49, 7  ;;  %vm333_vm3 = vcmask 64512  }
   0x8   :  { %v25_v34 = vld [vmem:[%s5145_s1 + $0x20] sm:$0xff]  ;;  %v160_v42 = vrot.slane %v37_v17, 4  ;;  %v4040_v43 = vpack.c.bf16 %v28_v41, %v27_v40  ;;  %v4594_v45 = vld [vmem:[%s5144_s0 + $0x8] sm:$0xff]  ;;  %v23_v46 = vld [vmem:[%s5145_s1 + $0x10] sm:$0xff]  ;;  %vm417_vm5 = vcmask 130048   ;;  %s4481_s26 = smov 64  }
   0x9   :  { %4025 = vmatpush3.bf16.msra.mxu0 %v4524_v6  ;;  %45 = vperm.xlu0 %4221, %v34_v12   ;;  %v4036_v38 = vpack.c.bf16 %v26_v35, %v25_v34  ;;  %v4586_v44 = vld [vmem:[%s5144_s0] sm:$0xff]  ;;  %v24_v47 = vld [vmem:[%s5145_s1 + $0x18] sm:$0xff]  ;;  %v4613_v53 = vsub.s32 0, %v4610_v51  ;;  %v4625_v58 = vld [vmem:[%s5145_s1 + $0x8] sm:$0xff]  ;;  %s4482_s27 = smov 88   ;;  %s4483_s28 = smov 120  }
   0xa   :  { %4027 = vmatprep.subr.bf16.mxu0 %v4542_v11  ;;  %55 = vperm.xlu1 %4222, %v36_v13   ;;  %v4604_v48 = vpack.c.bf16 %v24_v47, %v23_v46  ;;  %v4620_v57 = vld [vmem:[%s5145_s1] sm:$0xff]  ;;  %vm4648_vm4 = vmpackc.low %vm333_vm3, %vm333_vm3  ;;  %s4484_s29 = smov 80   ;;  %s4485_s30 = smov 112   ;;  %vm1583_vm6 = vcmask 195584   ;;  %vm3499_vm7 = vcmask 254976  }
   0xb   :  { %v239_v61 = vrot.slane %v37_v17, %v4613_v53  ;;  %s4486_s3 = smov 56   ;;  %s4487_s4 = smov 72  }
   0xc   :  { %s4488_s5 = smov 104   ;;  %s4489_s6 = smov 48  }
   0xd   :  { %4029 = vmatpush3.bf16.msra.mxu0 %v4542_v11  ;;  %4223 = vset.pattern.permute.xlu0 %v4479_v18  ;;  %s4490_s7 = smov 8   ;;  %s4491_s8 = smov 40  }
   0xe   :  { %3749 = vmatprep.subr.mxu0 %v4555_v14  ;;  %158 = vperm.xlu0 %4223, %v37_v17   ;;  %s4492_s9 = smov 16   ;;  %s4493_s11 = smov 24  }
  0x11   :  { %3750 = vmatpush3.msra.mxu0 %v4555_v14 }
  0x12   :  { %3752 = vmatmul.mubr.msk.f32.vlgmr.msra.gmra.mrb[0].mxu0 %vm58_vm0, %v34_v12  ;;  %4264 = vset.pattern.permute.xlu0 %v4475_v5 }
  0x13   :  { %3754 = vmatprep.mubr.msk.f32.mxu0 %vm58_vm0, %v35_v10  ;;  %329 = vrot.lane.b32.xlu0 %v4594_v45, %s4480_s21 }
  0x16   :  { %3755 = vmatmul.mubr.msk.f32.gmra.mrb[2].mxu0 %vm58_vm0, %v36_v13 }
  0x84   :  { %v41_v19 = vpop.permute.xlu0 %40 }
  0x85   :  { %v51_v20 = vpop.permute.xlu1 %50 }
  0x88   :  { %v46_v21 = vpop.permute.xlu0 %45 }
  0x89   :  { %v56_v27 = vpop.permute.xlu1 %55 }
  0x8d   :  { %v159_v50 = vpop.permute.xlu0 %158 }
  0x8e   :  { %v161_v52 = vrot.slane %v159_v50, 4 }
  0xe5   :  { %v3753_v22 = vpop.f32.mrb[0].mxu0 }
  0xe6   :  { %v139_v23 = vadd.f32 %v3753_v22, %v46_v21  ;;  %v133_v24 = vpop.f32.mrb[1].mxu0  ;;  %v4662_v21 = vpop.permute.xlu0 %329 }
  0xe7   :  { %v134_v25 = vadd.f32 %v133_v24, %v41_v19 }
  0xe8   :  { %v153_v26 = vmax.f32 %v139_v23, 0.0 }
  0xe9   :  { %v152_v28 = vmax.f32 %v134_v25, 0.0  ;;  %v3756_v29 = vpop.f32.mrb[2].mxu0 }
  0xea   :  { %v149_v30 = vadd.f32 %v3756_v29, %v56_v27  ;;  %v143_v31 = vpop.f32.mrb[3].mxu0 }
  0xeb   :  { %v144_v32 = vadd.f32 %v143_v31, %v51_v20  ;;  %v4031_v33 = vpack.c.bf16 %v153_v26, %v152_v28 }
  0xec   :  { %v155_v36 = vmax.f32 %v149_v30, 0.0 }
  0xed   :  { %v154_v37 = vmax.f32 %v144_v32, 0.0  ;;  %4032 = vmatpush3.bf16.msra.mxu1 %v4031_v33 }
  0xee   :  { %4033 = vmatprep.subr.bf16.mxu1 %v4476_v15 }
  0xef   :  { %v4034_v39 = vpack.c.bf16 %v155_v36, %v154_v37 }
  0xf1   :  { %4035 = vmatpush3.bf16.msra.mxu1 %v4034_v39 }
  0xf2   :  { %4037 = vmatprep.subr.bf16.mxu1 %v4036_v38 }
  0xf4   :  { %3766 = vmatmul.mubr.msk.f32.vlgmr.msra.gmra.mrb[0].mxu1 %vm163_vm2, %v160_v42 }
  0xf5   :  { %4039 = vmatpush3.bf16.msra.mxu1 %v4036_v38  ;;  %3776 = vmatprep.mubr.msk.f32.mxu1 %vm163_vm2, %v4586_v44 }
  0xf6   :  { %4041 = vmatprep.subr.bf16.mxu1 %v4040_v43 }
  0xf9   :  { %4043 = vmatpush3.bf16.msra.mxu1 %v4040_v43 }
  0xfa   :  { %4051 = vmatprep.subr.bf16.mxu1 %v4604_v48 }
  0xfc   :  { %3777 = vmatmul.mubr.msk.f32.vlgmr.msra.gmra.mrb[2].mxu1 %vm163_vm2, %v4594_v45 }
 0x102   :  { %4053 = vmatpush3.bf16.xpose.msra.mxu1 %v4604_v48 }
 0x1c7   :  { %v232_v54 = vpop.f32.mrb[0].mxu1 }
 0x1c8   :  { %v4615_v55 = vadd.f32 %v232_v54, %v161_v52  ;;  %v3767_v56 = vpop.f32.mrb[1].mxu1 }
 0x1ca   :  { %v443_v59 = vrot.slane %v4615_v55, %v4613_v53 }
 0x1cc   :  { %v444_v60 = vmul.f32 %v443_v59, %v4620_v57  ;;  %v445_v62 = vmul.f32 %v443_v59, %v4625_v58 }
 0x1ce   :  { %3790 = vmatprep.mubr.f32.mxu1 %v444_v60 }
 0x1cf   :  { %v3778_v63 = vpop.f32.mrb[2].mxu1  ;;  %3791 = vmatmul.mubr.f32.vlgmr.msra.gmra.mrb[4].mxu1 %v445_v62 }
 0x1d0   :  { %v4632_v0 = vadd.f32 %v3778_v63, %v239_v61  ;;  %v312_v1 = vpop.f32.mrb[3].mxu1 }
 0x1d1   :  { %v4634_v2 = vadd.f32 %v312_v1, %v239_v61 }
 0x1d3   :  { %3783 = vmatprep.mubr.msk.f32.mxu0 %vm333_vm3, %v4634_v2  ;;  %v4640_v4 = vpack.i.bf16 %v4632_v0, %v4634_v2 }
 0x1d5   :  { %4225 = vrot.lane.b32.xlu1 %v4640_v4, %s4480_s21 }
 0x1d9   :  { %327 = vrot.lane.b32.xlu1 %v4586_v44, %s4480_s21 }
 0x247   :  { %v4226_v5 = vpop.permute.xlu1 %4225 }
 0x248   :  { %v4228_v7 = vunpack.i.h.bf16 %v4226_v5  ;;  %v4227_v8 = vunpack.i.l.bf16 %v4226_v5 }
 0x24a   :  { %v4044_v10 = vpack.c.bf16 %v4228_v7, %v4227_v8 }
 0x24b   :  { %v4658_v12 = vpop.permute.xlu1 %327 }
 0x24c   :  { %4046 = vmatprep.subr.msk.bf16.mxu0 %vm4648_vm4, %v4044_v10 }
 0x24d   :  { %4049 = vmatpush3.bf16.xpose.msk.msra.mxu0 %vm4648_vm4, %v4044_v10 }
 0x254   :  { %3784 = vmatmul.mubr.msk.f32.vlgmr.msra.gmra.mrb[4].mxu0 %vm333_vm3, %v4632_v0 }
 0x2a2   :  { %v3792_v13 = vpop.f32.mrb[4].mxu1 }
 0x2a3   :  { %v512_v17 = vpop.f32.mrb[5].mxu1  ;;  %v518_v27 = vadd.f32 %v3792_v13, %v4662_v21 }
 0x2a4   :  { %v513_v19 = vadd.f32 %v512_v17, %v4658_v12 }
 0x2a5   :  { %v524_v29 = vsel %vm417_vm5, %v518_v27, -inf }
 0x2a6   :  { %v521_v20 = vsel %vm417_vm5, %v513_v19, -inf }
 0x2a7   :  { %522 = vmax.xlane.f32.xlu0 %v521_v20 }
 0x327   :  { %v3785_v22 = vpop.f32.mrb[4].mxu0 }
 0x328   :  { %v414_v23 = vadd.f32 %v3785_v22, %v4662_v21  ;;  %v408_v24 = vpop.f32.mrb[5].mxu0 }
 0x329   :  { %v409_v25 = vadd.f32 %v408_v24, %v4658_v12  ;;  %v4689_v24 = vsub.s32 1, %v4610_v51 }
 0x32a   :  { %v421_v26 = vsel %vm417_vm5, %v414_v23, -inf }
 0x32b   :  { %422 = vmax.xlane.f32.xlu0 %v421_v26  ;;  %v418_v28 = vsel %vm417_vm5, %v409_v25, -inf }
 0x32c   :  { %419 = vmax.xlane.f32.xlu1 %v418_v28 }
 0x330   :  { %525 = vmax.xlane.f32.xlu1 %v524_v29 }
 0x334   :  { %v523_v30 = vpop.xlane.xlu0 %522 }
 0x335   :  { %v527_v36 = vsub.f32 %v513_v19, %v523_v30 }
 0x337   :  { %v529_v40 = vmul.f32 1.442695, %v527_v36 }
 0x3b8   :  { %v423_v31 = vpop.xlane.xlu0 %422 }
 0x3b9   :  { %v425_v32 = vsub.f32 %v414_v23, %v423_v31  ;;  %v420_v33 = vpop.xlane.xlu1 %419  ;;  %v750_v31 = vrot.slane %v4615_v55, %v4689_v24 }
 0x3ba   :  { %v424_v34 = vsub.f32 %v409_v25, %v420_v33 }
 0x3bb   :  { %v428_v35 = vmul.f32 1.442695, %v425_v32  ;;  %v752_v36 = vmul.f32 %v750_v31, %v4625_v58 }
 0x3bc   :  { %v426_v37 = vmul.f32 1.442695, %v424_v34 }
 0x3bd   :  { %4307 = vpow2.f32 %v428_v35  ;;  %v526_v38 = vpop.xlane.xlu1 %525  ;;  %v751_v35 = vmul.f32 %v750_v31, %v4620_v57 }
 0x3be   :  { %v528_v39 = vsub.f32 %v518_v27, %v526_v38  ;;  %4309 = vpow2.f32 %v426_v37 }
 0x3c0   :  { %v531_v41 = vmul.f32 1.442695, %v528_v39 }
 0x3c2   :  { %4311 = vpow2.f32 %v531_v41 }
 0x3c3   :  { %4313 = vpow2.f32 %v529_v40 }
 0x3c7   :  { %v4308_v42 = vpop.eup %4307 }
 0x3c8   :  { %v433_v43 = vsel %vm417_vm5, %v4308_v42, 0.0  ;;  %v4310_v46 = vpop.eup %4309 }
 0x3c9   :  { %434 = vadd.xlane.f32.xlu0 %v433_v43  ;;  %v430_v49 = vsel %vm417_vm5, %v4310_v46, 0.0 }
 0x3cc   :  { %v4312_v47 = vpop.eup %4311 }
 0x3cd   :  { %431 = vadd.xlane.f32.xlu0 %v430_v49  ;;  %v536_v50 = vsel %vm417_vm5, %v4312_v47, 0.0  ;;  %v4314_v52 = vpop.eup %4313 }
 0x3ce   :  { %537 = vadd.xlane.f32.xlu1 %v536_v50  ;;  %v533_v54 = vsel %vm417_vm5, %v4314_v52, 0.0 }
 0x3d2   :  { %534 = vadd.xlane.f32.xlu1 %v533_v54 }
 0x3e3   :  { %4230 = vrot.lane.b32.xlu0 %v4640_v4, %s4481_s26  ;;  %4235 = vrot.lane.b32.xlu1 %v4640_v4, %s4482_s27 }
 0x3e7   :  { %636 = vrot.lane.b32.xlu0 %v4632_v0, %s4483_s28  ;;  %634 = vrot.lane.b32.xlu1 %v4634_v2, %s4483_s28 }
 0x456   :  { %v435_v56 = vpop.xlane.xlu0 %434 }
 0x45a   :  { %v432_v59 = vpop.xlane.xlu0 %431 }
 0x45b   :  { %v538_v60 = vpop.xlane.xlu1 %537 }
 0x45c   :  { %4315 = vrcp.f32 %v538_v60 }
 0x45d   :  { %4317 = vrcp.f32 %v435_v56 }
 0x45e   :  { %4319 = vrcp.f32 %v432_v59  ;;  %v4231_v61 = vpop.permute.xlu0 %4230 }
 0x45f   :  { %v4233_v62 = vunpack.i.h.bf16 %v4231_v61  ;;  %v4232_v63 = vunpack.i.l.bf16 %v4231_v61  ;;  %v535_v1 = vpop.xlane.xlu1 %534 }
 0x460   :  { %4321 = vrcp.f32 %v535_v1 }
 0x461   :  { %v4054_v5 = vpack.c.bf16 %v4233_v62, %v4232_v63 }
 0x462   :  { %v637_v32 = vpop.permute.xlu0 %636 }
 0x463   :  { %4055 = vmatprep.subr.bf16.mxu0 %v4054_v5  ;;  %v4236_v7 = vpop.permute.xlu1 %4235 }
 0x464   :  { %v4238_v8 = vunpack.i.h.bf16 %v4236_v7  ;;  %v4237_v10 = vunpack.i.l.bf16 %v4236_v7  ;;  %4057 = vmatpush3.bf16.msra.mxu0 %v4054_v5 }
 0x465   :  { %4065 = vmatprep.subr.bf16.mxu0 %v4604_v48 }
 0x466   :  { %v4316_v13 = vpop.eup %4315  ;;  %v4058_v17 = vpack.c.bf16 %v4238_v8, %v4237_v10 }
 0x467   :  { %v4318_v19 = vpop.eup %4317  ;;  %v635_v20 = vpop.permute.xlu1 %634  ;;  %v542_v23 = vmul.f32 %v4316_v13, %v4312_v47 }
 0x468   :  { %v4320_v22 = vpop.eup %4319  ;;  %4060 = vmatprep.subr.msk.bf16.mxu1 %vm4648_vm4, %v4058_v17  ;;  %3804 = vmatprep.mubr.msk.f32.mxu1 %vm333_vm3, %v635_v20  ;;  %v439_v26 = vmul.f32 %v4318_v19, %v4308_v42 }
 0x469   :  { %4063 = vmatpush3.bf16.xpose.msk.msra.mxu1 %vm4648_vm4, %v4058_v17  ;;  %v437_v27 = vmul.f32 %v4320_v22, %v4310_v46 }
 0x46a   :  { %v4322_v25 = vpop.eup %4321  ;;  %v544_v29 = vadd.f32 %v542_v23, %v439_v26 }
 0x46b   :  { %v540_v28 = vmul.f32 %v4322_v25, %v4314_v52 }
 0x46c   :  { %v546_v34 = vmul.f32 0.5, %v544_v29 }
 0x46d   :  { %v543_v30 = vadd.f32 %v540_v28, %v437_v27 }
 0x46f   :  { %v545_v33 = vmul.f32 0.5, %v543_v30 }
 0x470   :  { %3805 = vmatmul.mubr.msk.f32.vlgmr.msra.gmra.mrb[6].mxu1 %vm333_vm3, %v637_v32 }
 0x471   :  { %3797 = vmatprep.mubr.msk.f32.mxu0 %vm417_vm5, %v545_v33 }
 0x472   :  { %3798 = vmatmul.mubr.msk.f32.vlgmr.msra.gmra.mrb[6].mxu0 %vm417_vm5, %v546_v34 }
 0x473   :  { %4067 = vmatpush3.bf16.xpose.msra.mxu0 %v4604_v48  ;;  %3811 = vmatprep.mubr.f32.mxu0 %v751_v35 }
 0x47a   :  { %3812 = vmatmul.mubr.f32.vlgmr.msra.gmra.mrb[8].mxu0 %v752_v36 }
 0x543   :  { %v3806_v37 = vpop.f32.mrb[6].mxu1 }
 0x544   :  { %v716_v38 = vpop.f32.mrb[7].mxu1  ;;  %v722_v52 = vadd.f32 %v3806_v37, %v4662_v21 }
 0x545   :  { %v717_v39 = vadd.f32 %v716_v38, %v4658_v12  ;;  %v4700_v40 = vpop.f32.mrb[6].mxu0 }
 0x546   :  { %v4702_v41 = vpop.f32.mrb[7].mxu0  ;;  %v728_v56 = vsel %vm417_vm5, %v722_v52, -inf }
 0x547   :  { %v725_v42 = vsel %vm417_vm5, %v717_v39, -inf }
 0x548   :  { %726 = vmax.xlane.f32.xlu1 %v725_v42 }
 0x54d   :  { %v3813_v43 = vpop.f32.mrb[8].mxu0 }
 0x54e   :  { %v825_v46 = vadd.f32 %v3813_v43, %v4662_v21  ;;  %v819_v47 = vpop.f32.mrb[9].mxu0 }
 0x54f   :  { %v820_v49 = vadd.f32 %v819_v47, %v4658_v12 }
 0x550   :  { %v831_v50 = vsel %vm417_vm5, %v825_v46, -inf }
 0x551   :  { %832 = vmax.xlane.f32.xlu1 %v831_v50  ;;  %v828_v54 = vsel %vm417_vm5, %v820_v49, -inf }
 0x552   :  { %829 = vmax.xlane.f32.xlu0 %v828_v54 }
 0x556   :  { %729 = vmax.xlane.f32.xlu0 %v728_v56 }
 0x5d5   :  { %v727_v59 = vpop.xlane.xlu1 %726 }
 0x5d6   :  { %v731_v60 = vsub.f32 %v717_v39, %v727_v59 }
 0x5d8   :  { %v733_v61 = vmul.f32 1.442695, %v731_v60 }
 0x5da   :  { %4323 = vpow2.f32 %v733_v61 }
 0x5de   :  { %v833_v62 = vpop.xlane.xlu1 %832 }
 0x5df   :  { %v835_v63 = vsub.f32 %v825_v46, %v833_v62  ;;  %v830_v1 = vpop.xlane.xlu0 %829 }
 0x5e0   :  { %v834_v5 = vsub.f32 %v820_v49, %v830_v1  ;;  %v4729_v49 = vsub.s32 2, %v4610_v51 }
 0x5e1   :  { %v838_v7 = vmul.f32 1.442695, %v835_v63 }
 0x5e2   :  { %v836_v8 = vmul.f32 1.442695, %v834_v5  ;;  %v1057_v62 = vrot.slane %v4615_v55, %v4729_v49 }
 0x5e3   :  { %4325 = vpow2.f32 %v838_v7  ;;  %v730_v10 = vpop.xlane.xlu0 %729 }
 0x5e4   :  { %v4324_v13 = vpop.eup %4323  ;;  %v732_v17 = vsub.f32 %v722_v52, %v730_v10  ;;  %4327 = vpow2.f32 %v836_v8  ;;  %v1058_v8 = vmul.f32 %v1057_v62, %v4620_v57  ;;  %v1059_v10 = vmul.f32 %v1057_v62, %v4625_v58 }
 0x5e5   :  { %v737_v19 = vsel %vm417_vm5, %v4324_v13, 0.0 }
 0x5e6   :  { %v735_v20 = vmul.f32 1.442695, %v732_v17  ;;  %738 = vadd.xlane.f32.xlu0 %v737_v19 }
 0x5e8   :  { %4329 = vpow2.f32 %v735_v20 }
 0x5ed   :  { %v4326_v22 = vpop.eup %4325 }
 0x5ee   :  { %v843_v23 = vsel %vm417_vm5, %v4326_v22, 0.0  ;;  %v4328_v25 = vpop.eup %4327 }
 0x5ef   :  { %844 = vadd.xlane.f32.xlu1 %v843_v23  ;;  %v840_v27 = vsel %vm417_vm5, %v4328_v25, 0.0 }
 0x5f2   :  { %v4330_v26 = vpop.eup %4329 }
 0x5f3   :  { %841 = vadd.xlane.f32.xlu1 %v840_v27  ;;  %v740_v28 = vsel %vm417_vm5, %v4330_v26, 0.0 }
 0x5f4   :  { %741 = vadd.xlane.f32.xlu0 %v740_v28 }
 0x604   :  { %4245 = vrot.lane.b32.xlu1 %v4640_v4, %s4484_s29 }
 0x608   :  { %941 = vrot.lane.b32.xlu1 %v4634_v2, %s4485_s30 }
 0x60a   :  { %4240 = vrot.lane.b32.xlu0 %v4640_v4, %s4486_s3 }
 0x60e   :  { %943 = vrot.lane.b32.xlu0 %v4632_v0, %s4485_s30 }
 0x673   :  { %v739_v29 = vpop.xlane.xlu0 %738 }
 0x674   :  { %4331 = vrcp.f32 %v739_v29 }
 0x67c   :  { %v845_v30 = vpop.xlane.xlu1 %844 }
 0x67d   :  { %4333 = vrcp.f32 %v845_v30 }
 0x67e   :  { %v4332_v46 = vpop.eup %4331 }
 0x67f   :  { %v744_v54 = vmul.f32 %v4332_v46, %v4324_v13 }
 0x680   :  { %v842_v31 = vpop.xlane.xlu1 %841 }
 0x681   :  { %4335 = vrcp.f32 %v842_v31  ;;  %v742_v32 = vpop.xlane.xlu0 %741 }
 0x682   :  { %4337 = vrcp.f32 %v742_v32 }
 0x684   :  { %v4246_v33 = vpop.permute.xlu1 %4245 }
 0x685   :  { %v4248_v34 = vunpack.i.h.bf16 %v4246_v33  ;;  %v4247_v35 = vunpack.i.l.bf16 %v4246_v33  ;;  %v4241_v36 = vpop.permute.xlu0 %4240 }
 0x686   :  { %v4243_v37 = vunpack.i.h.bf16 %v4241_v36  ;;  %v4242_v38 = vunpack.i.l.bf16 %v4241_v36 }
 0x687   :  { %v4072_v39 = vpack.c.bf16 %v4248_v34, %v4247_v35  ;;  %v4334_v47 = vpop.eup %4333 }
 0x688   :  { %v4068_v42 = vpack.c.bf16 %v4243_v37, %v4242_v38  ;;  %v942_v43 = vpop.permute.xlu1 %941  ;;  %v849_v59 = vmul.f32 %v4334_v47, %v4326_v22 }
 0x689   :  { %4074 = vmatprep.subr.msk.bf16.mxu0 %vm4648_vm4, %v4072_v39  ;;  %3825 = vmatprep.mubr.msk.f32.mxu0 %vm333_vm3, %v942_v43  ;;  %v944_v1 = vpop.permute.xlu0 %943 }
 0x68a   :  { %4069 = vmatprep.subr.bf16.mxu1 %v4068_v42  ;;  %4077 = vmatpush3.bf16.xpose.msk.msra.mxu0 %vm4648_vm4, %v4072_v39 }
 0x68b   :  { %v4336_v50 = vpop.eup %4335  ;;  %4071 = vmatpush3.bf16.msra.mxu1 %v4068_v42 }
 0x68c   :  { %v4338_v52 = vpop.eup %4337  ;;  %v847_v56 = vmul.f32 %v4336_v50, %v4328_v25  ;;  %4079 = vmatprep.subr.bf16.mxu1 %v4604_v48 }
 0x68d   :  { %v746_v60 = vmul.f32 %v4338_v52, %v4330_v26 }
 0x68e   :  { %v850_v61 = vadd.f32 %v847_v56, %v744_v54 }
 0x68f   :  { %v851_v63 = vadd.f32 %v849_v59, %v746_v60 }
 0x690   :  { %v852_v5 = vmul.f32 0.5, %v850_v61 }
 0x691   :  { %3826 = vmatmul.mubr.msk.f32.vlgmr.msra.gmra.mrb[10].mxu0 %vm333_vm3, %v944_v1  ;;  %v853_v7 = vmul.f32 0.5, %v851_v63 }
 0x692   :  { %3818 = vmatprep.mubr.msk.f32.mxu1 %vm417_vm5, %v852_v5 }
 0x693   :  { %3819 = vmatmul.mubr.msk.f32.vlgmr.msra.gmra.mrb[8].mxu1 %vm417_vm5, %v853_v7 }
 0x694   :  { %4081 = vmatpush3.bf16.xpose.msra.mxu1 %v4604_v48  ;;  %3832 = vmatprep.mubr.f32.mxu1 %v1058_v8 }
 0x69b   :  { %3833 = vmatmul.mubr.f32.vlgmr.msra.gmra.mrb[10].mxu1 %v1059_v10 }
 0x764   :  { %v3827_v13 = vpop.f32.mrb[10].mxu0 }
 0x765   :  { %v1023_v17 = vpop.f32.mrb[11].mxu0  ;;  %v1029_v30 = vadd.f32 %v3827_v13, %v4662_v21 }
 0x766   :  { %v1024_v19 = vadd.f32 %v1023_v17, %v4658_v12  ;;  %v4741_v20 = vpop.f32.mrb[8].mxu1 }
 0x767   :  { %v4743_v22 = vpop.f32.mrb[9].mxu1  ;;  %v1035_v32 = vsel %vm417_vm5, %v1029_v30, -inf }
 0x768   :  { %v1032_v23 = vsel %vm417_vm5, %v1024_v19, -inf }
 0x769   :  { %1033 = vmax.xlane.f32.xlu1 %v1032_v23 }
 0x76e   :  { %v3834_v25 = vpop.f32.mrb[10].mxu1 }
 0x76f   :  { %v1132_v26 = vadd.f32 %v3834_v25, %v4662_v21  ;;  %v1126_v27 = vpop.f32.mrb[11].mxu1 }
 0x770   :  { %v1127_v28 = vadd.f32 %v1126_v27, %v4658_v12 }
 0x771   :  { %v1138_v29 = vsel %vm417_vm5, %v1132_v26, -inf }
 0x772   :  { %1139 = vmax.xlane.f32.xlu1 %v1138_v29  ;;  %v1135_v31 = vsel %vm417_vm5, %v1127_v28, -inf  ;;  %v4770_v29 = vsub.s32 3, %v4610_v51 }
 0x773   :  { %1136 = vmax.xlane.f32.xlu0 %v1135_v31 }
 0x777   :  { %1036 = vmax.xlane.f32.xlu0 %v1035_v32 }
 0x7f6   :  { %v1034_v33 = vpop.xlane.xlu1 %1033 }
 0x7f7   :  { %v1038_v34 = vsub.f32 %v1024_v19, %v1034_v33 }
 0x7f9   :  { %v1040_v35 = vmul.f32 1.442695, %v1038_v34 }
 0x7fb   :  { %4339 = vpow2.f32 %v1040_v35 }
 0x7ff   :  { %v1140_v36 = vpop.xlane.xlu1 %1139 }
 0x800   :  { %v1142_v37 = vsub.f32 %v1132_v26, %v1140_v36  ;;  %v1137_v38 = vpop.xlane.xlu0 %1136 }
 0x801   :  { %v1141_v39 = vsub.f32 %v1127_v28, %v1137_v38 }
 0x802   :  { %v1145_v42 = vmul.f32 1.442695, %v1142_v37  ;;  %v1364_v37 = vrot.slane %v4615_v55, %v4770_v29 }
 0x803   :  { %v1143_v43 = vmul.f32 1.442695, %v1141_v39 }
 0x804   :  { %4341 = vpow2.f32 %v1145_v42  ;;  %v1037_v46 = vpop.xlane.xlu0 %1036 }
 0x805   :  { %v4340_v47 = vpop.eup %4339  ;;  %v1039_v50 = vsub.f32 %v1029_v30, %v1037_v46  ;;  %4343 = vpow2.f32 %v1143_v43  ;;  %v1365_v43 = vmul.f32 %v1364_v37, %v4620_v57  ;;  %v1366_v46 = vmul.f32 %v1364_v37, %v4625_v58 }
 0x806   :  { %v1044_v52 = vsel %vm417_vm5, %v4340_v47, 0.0 }
 0x807   :  { %v1042_v54 = vmul.f32 1.442695, %v1039_v50  ;;  %1045 = vadd.xlane.f32.xlu0 %v1044_v52 }
 0x809   :  { %4345 = vpow2.f32 %v1042_v54 }
 0x80e   :  { %v4342_v56 = vpop.eup %4341 }
 0x80f   :  { %v1150_v59 = vsel %vm417_vm5, %v4342_v56, 0.0  ;;  %v4344_v60 = vpop.eup %4343 }
 0x810   :  { %1151 = vadd.xlane.f32.xlu1 %v1150_v59  ;;  %v1147_v62 = vsel %vm417_vm5, %v4344_v60, 0.0 }
 0x813   :  { %v4346_v61 = vpop.eup %4345 }
 0x814   :  { %1148 = vadd.xlane.f32.xlu1 %v1147_v62  ;;  %v1047_v63 = vsel %vm417_vm5, %v4346_v61, 0.0 }
 0x815   :  { %1048 = vadd.xlane.f32.xlu0 %v1047_v63 }
 0x825   :  { %4255 = vrot.lane.b32.xlu1 %v4640_v4, %s4487_s4 }
 0x829   :  { %1248 = vrot.lane.b32.xlu1 %v4634_v2, %s4488_s5 }
 0x82b   :  { %4250 = vrot.lane.b32.xlu0 %v4640_v4, %s4489_s6 }
 0x82f   :  { %1250 = vrot.lane.b32.xlu0 %v4632_v0, %s4488_s5 }
 0x894   :  { %v1046_v1 = vpop.xlane.xlu0 %1045 }
 0x895   :  { %4347 = vrcp.f32 %v1046_v1 }
 0x89d   :  { %v1152_v5 = vpop.xlane.xlu1 %1151 }
 0x89e   :  { %4349 = vrcp.f32 %v1152_v5 }
 0x89f   :  { %v4348_v28 = vpop.eup %4347 }
 0x8a0   :  { %v1051_v32 = vmul.f32 %v4348_v28, %v4340_v47 }
 0x8a1   :  { %v1149_v7 = vpop.xlane.xlu1 %1148 }
 0x8a2   :  { %4351 = vrcp.f32 %v1149_v7  ;;  %v1049_v8 = vpop.xlane.xlu0 %1048 }
 0x8a3   :  { %4353 = vrcp.f32 %v1049_v8 }
 0x8a5   :  { %v4256_v10 = vpop.permute.xlu1 %4255 }
 0x8a6   :  { %v4258_v13 = vunpack.i.h.bf16 %v4256_v10  ;;  %v4257_v17 = vunpack.i.l.bf16 %v4256_v10  ;;  %v4251_v19 = vpop.permute.xlu0 %4250 }
 0x8a7   :  { %v4253_v2 = vunpack.i.h.bf16 %v4251_v19  ;;  %v4252_v23 = vunpack.i.l.bf16 %v4251_v19 }
 0x8a8   :  { %v4086_v25 = vpack.c.bf16 %v4258_v13, %v4257_v17  ;;  %v4350_v0 = vpop.eup %4349 }
 0x8a9   :  { %v4082_v26 = vpack.c.bf16 %v4253_v2, %v4252_v23  ;;  %v1249_v27 = vpop.permute.xlu1 %1248  ;;  %v1156_v34 = vmul.f32 %v4350_v0, %v4342_v56 }
 0x8aa   :  { %4088 = vmatprep.subr.msk.bf16.mxu1 %vm4648_vm4, %v4086_v25  ;;  %3846 = vmatprep.mubr.msk.f32.mxu1 %vm333_vm3, %v1249_v27  ;;  %v1251_v39 = vpop.permute.xlu0 %1250 }
 0x8ab   :  { %4083 = vmatprep.subr.bf16.mxu0 %v4082_v26  ;;  %4091 = vmatpush3.bf16.xpose.msk.msra.mxu1 %vm4648_vm4, %v4086_v25 }
 0x8ac   :  { %v4352_v30 = vpop.eup %4351  ;;  %4085 = vmatpush3.bf16.msra.mxu0 %v4082_v26 }
 0x8ad   :  { %v4354_v31 = vpop.eup %4353  ;;  %v1154_v33 = vmul.f32 %v4352_v30, %v4344_v60  ;;  %4093 = vmatprep.subr.bf16.mxu0 %v4604_v48 }
 0x8ae   :  { %v1053_v35 = vmul.f32 %v4354_v31, %v4346_v61 }
 0x8af   :  { %v1157_v36 = vadd.f32 %v1154_v33, %v1051_v32 }
 0x8b0   :  { %v1158_v38 = vadd.f32 %v1156_v34, %v1053_v35 }
 0x8b1   :  { %v1159_v42 = vmul.f32 0.5, %v1157_v36 }
 0x8b2   :  { %3847 = vmatmul.mubr.msk.f32.vlgmr.msra.gmra.mrb[12].mxu1 %vm333_vm3, %v1251_v39  ;;  %v1160_v51 = vmul.f32 0.5, %v1158_v38 }
 0x8b3   :  { %3839 = vmatprep.mubr.msk.f32.mxu0 %vm417_vm5, %v1159_v42 }
 0x8b4   :  { %3840 = vmatmul.mubr.msk.f32.vlgmr.msra.gmra.mrb[12].mxu0 %vm417_vm5, %v1160_v51 }
 0x8b5   :  { %4095 = vmatpush3.bf16.xpose.msra.mxu0 %v4604_v48  ;;  %3853 = vmatprep.mubr.f32.mxu0 %v1365_v43 }
 0x8bc   :  { %3854 = vmatmul.mubr.f32.vlgmr.msra.gmra.mrb[14].mxu0 %v1366_v46 }
 0x985   :  { %v3848_v47 = vpop.f32.mrb[12].mxu1 }
 0x986   :  { %v1330_v55 = vpop.f32.mrb[13].mxu1  ;;  %v1336_v58 = vadd.f32 %v3848_v47, %v4662_v21 }
 0x987   :  { %v1331_v50 = vadd.f32 %v1330_v55, %v4658_v12  ;;  %v3841_v52 = vpop.f32.mrb[12].mxu0 }
 0x988   :  { %v1239_v54 = vpop.f32.mrb[13].mxu0  ;;  %v1342_v1 = vsel %vm417_vm5, %v1336_v58, -inf }
 0x989   :  { %v1339_v56 = vsel %vm417_vm5, %v1331_v50, -inf }
 0x98a   :  { %1340 = vmax.xlane.f32.xlu1 %v1339_v56 }
 0x98f   :  { %v3855_v59 = vpop.f32.mrb[14].mxu0 }
 0x990   :  { %v1439_v57 = vadd.f32 %v3855_v59, %v4662_v21  ;;  %v1433_v60 = vpop.f32.mrb[15].mxu0 }
 0x991   :  { %v1434_v61 = vadd.f32 %v1433_v60, %v4658_v12 }
 0x992   :  { %v1445_v62 = vsel %vm417_vm5, %v1439_v57, -inf }
 0x993   :  { %1446 = vmax.xlane.f32.xlu1 %v1445_v62  ;;  %v1442_v63 = vsel %vm417_vm5, %v1434_v61, -inf }
 0x994   :  { %1443 = vmax.xlane.f32.xlu0 %v1442_v63  ;;  %v4830_v63 = vld [vmem:[%s5145_s1 + $0xd0] sm:$0xff] }
 0x998   :  { %1343 = vmax.xlane.f32.xlu0 %v1342_v1  ;;  %v1721_v1 = vld [vmem:[%s5145_s1 + $0xd8] sm:$0xff] }
 0xa17   :  { %v1341_v5 = vpop.xlane.xlu1 %1340 }
 0xa18   :  { %v1345_v7 = vsub.f32 %v1331_v50, %v1341_v5  ;;  %v1722_v5 = vld [vmem:[%s5145_s1 + $0xe0] sm:$0xff] }
 0xa1a   :  { %v1347_v8 = vmul.f32 1.442695, %v1345_v7 }
 0xa1c   :  { %4355 = vpow2.f32 %v1347_v8 }
 0xa20   :  { %v1447_v10 = vpop.xlane.xlu1 %1446 }
 0xa21   :  { %v1449_v13 = vsub.f32 %v1439_v57, %v1447_v10  ;;  %v1444_v17 = vpop.xlane.xlu0 %1443 }
 0xa22   :  { %v1448_v19 = vsub.f32 %v1434_v61, %v1444_v17  ;;  %v29_v61 = vld [vmem:[%s5145_s1 + $0x40] sm:$0xff] }
 0xa23   :  { %v1452_v2 = vmul.f32 1.442695, %v1449_v13 }
 0xa24   :  { %v1450_v23 = vmul.f32 1.442695, %v1448_v19 }
 0xa25   :  { %v1344_v25 = vpop.xlane.xlu0 %1343 }
 0xa26   :  { %v4356_v26 = vpop.eup %4355  ;;  %4357 = vpow2.f32 %v1450_v23  ;;  %v1346_v27 = vsub.f32 %v1336_v58, %v1344_v25 }
 0xa27   :  { %v1351_v28 = vsel %vm417_vm5, %v4356_v26, 0.0  ;;  %4359 = vpow2.f32 %v1452_v2 }
 0xa28   :  { %v1349_v0 = vmul.f32 1.442695, %v1346_v27  ;;  %1352 = vadd.xlane.f32.xlu0 %v1351_v28 }
 0xa2a   :  { %4361 = vpow2.f32 %v1349_v0 }
 0xa30   :  { %v4358_v30 = vpop.eup %4357 }
 0xa31   :  { %v1454_v31 = vsel %vm417_vm5, %v4358_v30, 0.0  ;;  %v4360_v32 = vpop.eup %4359 }
 0xa32   :  { %1455 = vadd.xlane.f32.xlu1 %v1454_v31  ;;  %v1457_v35 = vsel %vm417_vm5, %v4360_v32, 0.0 }
 0xa34   :  { %v4362_v33 = vpop.eup %4361 }
 0xa35   :  { %v1354_v34 = vsel %vm417_vm5, %v4362_v33, 0.0 }
 0xa36   :  { %1355 = vadd.xlane.f32.xlu0 %v1354_v34  ;;  %1458 = vadd.xlane.f32.xlu1 %v1457_v35 }
 0xa47   :  { %1557 = vrot.lane.b32.xlu1 %v4743_v22, %s4490_s7 }
 0xa4b   :  { %1559 = vrot.lane.b32.xlu1 %v4741_v20, %s4490_s7 }
 0xa4c   :  { %4260 = vrot.lane.b32.xlu0 %v4640_v4, %s4491_s8 }
 0xa4f   :  { %1567 = vrot.lane.b32.xlu1 %v3841_v52, %s4492_s9 }
 0xa50   :  { %1565 = vrot.lane.b32.xlu0 %v1239_v54, %s4492_s9 }
 0xab5   :  { %v1353_v36 = vpop.xlane.xlu0 %1352 }
 0xab6   :  { %4363 = vrcp.f32 %v1353_v36 }
 0xabf   :  { %v1456_v37 = vpop.xlane.xlu1 %1455 }
 0xac0   :  { %4365 = vrcp.f32 %v1456_v37  ;;  %v4364_v42 = vpop.eup %4363 }
 0xac1   :  { %v1358_v4 = vmul.f32 %v4364_v42, %v4356_v26 }
 0xac3   :  { %v1356_v38 = vpop.xlane.xlu0 %1355  ;;  %v1459_v39 = vpop.xlane.xlu1 %1458 }
 0xac4   :  { %4367 = vrcp.f32 %v1356_v38 }
 0xac5   :  { %4369 = vrcp.f32 %v1459_v39 }
 0xac7   :  { %v4261_v22 = vpop.permute.xlu0 %4260  ;;  %v1558_v10 = vpop.permute.xlu1 %1557 }
 0xac8   :  { %v4263_v20 = vunpack.i.h.bf16 %v4261_v22  ;;  %v4262_v51 = vunpack.i.l.bf16 %v4261_v22  ;;  %v1579_v2 = vsel %vm333_vm3, %v4702_v41, %v1558_v10  ;;  %v4860_v41 = vld [vmem:[%s5145_s1 + $0x80] sm:$0xff] }
 0xaca   :  { %v4366_v43 = vpop.eup %4365  ;;  %v4096_v46 = vpack.c.bf16 %v4263_v20, %v4262_v51 }
 0xacb   :  { %v1461_v47 = vmul.f32 %v4366_v43, %v4358_v30  ;;  %v1560_v13 = vpop.permute.xlu1 %1559  ;;  %v1566_v19 = vpop.permute.xlu0 %1565 }
 0xacc   :  { %4097 = vmatprep.subr.bf16.mxu1 %v4096_v46  ;;  %v1581_v25 = vsel %vm417_vm5, %v1579_v2, %v1566_v19  ;;  %v1580_v26 = vsel %vm333_vm3, %v4700_v40, %v1560_v13  ;;  %v1589_v40 = vrot.slane %v4860_v41, %v4689_v24  ;;  %v1711_v19 = vld [vmem:[%s5145_s1 + $0x88] sm:$0xff]  ;;  %v1712_v2 = vld [vmem:[%s5145_s1 + $0x90] sm:$0xff] }
 0xacd   :  { %4099 = vmatpush3.bf16.msra.mxu1 %v4096_v46  ;;  %v1464_v55 = vadd.f32 %v1461_v47, %v1358_v4 }
 0xace   :  { %v4368_v50 = vpop.eup %4367  ;;  %4109 = vmatprep.subr.bf16.mxu1 %v4519_v3 }
 0xacf   :  { %v4370_v52 = vpop.eup %4369  ;;  %v1360_v54 = vmul.f32 %v4368_v50, %v4362_v33  ;;  %v1466_v56 = vmul.f32 0.5, %v1464_v55  ;;  %v1568_v17 = vpop.permute.xlu1 %1567 }
 0xad0   :  { %v1463_v59 = vmul.f32 %v4370_v52, %v4360_v32  ;;  %v1582_v28 = vsel %vm417_vm5, %v1580_v26, %v1568_v17 }
 0xad1   :  { %3860 = vmatprep.mubr.msk.f32.mxu1 %vm417_vm5, %v1466_v56 }
 0xad2   :  { %v1465_v57 = vadd.f32 %v1463_v59, %v1360_v54 }
 0xad4   :  { %v1467_v60 = vmul.f32 0.5, %v1465_v57 }
 0xad6   :  { %3861 = vmatmul.mubr.msk.f32.vlgmr.msra.gmra.mrb[14].mxu1 %vm417_vm5, %v1467_v60 }
 0xad7   :  { %4111 = vmatpush3.bf16.msra.mxu1 %v4519_v3  ;;  %v30_v3 = vld [vmem:[%s5145_s1 + $0x48] sm:$0xff] }
 0xad8   :  { %4113 = vmatprep.subr.bf16.mxu1 %v4524_v6  ;;  %v4100_v62 = vpack.c.bf16 %v30_v3, %v29_v61 }
 0xada   :  { %4101 = vmatprep.subr.bf16.mxu0 %v4100_v62 }
 0xadb   :  { %4115 = vmatpush3.bf16.msra.mxu1 %v4524_v6  ;;  %v31_v6 = vld [vmem:[%s5145_s1 + $0x50] sm:$0xff]  ;;  %4103 = vmatpush3.bf16.msra.mxu0 %v4100_v62  ;;  %v4876_v62 = vld [vmem:[%s5145_s1 + $0xe8] sm:$0xff] }
 0xadc   :  { %4117 = vmatprep.subr.bf16.mxu1 %v4542_v11 }
 0xadf   :  { %4119 = vmatpush3.bf16.msra.mxu1 %v4542_v11  ;;  %v32_v11 = vld [vmem:[%s5145_s1 + $0x58] sm:$0xff] }
 0xae0   :  { %3886 = vmatprep.subr.mxu1 %v4555_v14  ;;  %v4104_v58 = vpack.c.bf16 %v32_v11, %v31_v6 }
 0xae2   :  { %4105 = vmatprep.subr.bf16.mxu0 %v4104_v58 }
 0xae3   :  { %3887 = vmatpush3.msra.mxu1 %v4555_v14  ;;  %4107 = vmatpush3.bf16.msra.mxu0 %v4104_v58  ;;  %v1719_v14 = vld [vmem:[%s5145_s1 + $0xc8] sm:$0xff] }
 0xae4   :  { %4120 = vmatprep.subr.bf16.mxu0 %v4476_v15  ;;  %3888 = vmatprep.mubr.msk.f32.mxu1 %vm58_vm0, %v1719_v14 }
 0xae5   :  { %3889 = vmatmul.mubr.msk.f32.vlgmr.msra.gmra.mrb[16].mxu1 %vm58_vm0, %v4830_v63 }
 0xae6   :  { %3891 = vmatprep.mubr.msk.f32.mxu1 %vm58_vm0, %v1721_v1 }
 0xae9   :  { %3892 = vmatmul.mubr.msk.f32.gmra.mrb[18].mxu1 %vm58_vm0, %v1722_v5 }
 0xba9   :  { %v3862_v7 = vpop.f32.mrb[14].mxu1 }
 0xbaa   :  { %1575 = vrot.lane.b32.xlu1 %v3862_v7, %s4493_s11  ;;  %v1546_v8 = vpop.f32.mrb[15].mxu1 }
 0xbab   :  { %1573 = vrot.lane.b32.xlu0 %v1546_v8, %s4493_s11 }
 0xbb8   :  { %v3890_v39 = vpop.f32.mrb[16].mxu1 }
 0xbb9   :  { %v1818_v22 = vpop.f32.mrb[17].mxu1 }
 0xbbc   :  { %v3893_v42 = vpop.f32.mrb[18].mxu1 }
 0xbbd   :  { %v1828_v20 = vpop.f32.mrb[19].mxu1 }
 0xc1c   :  { %v1576_v23 = vpop.permute.xlu1 %1575 }
 0xc1d   :  { %v1574_v27 = vpop.permute.xlu0 %1573  ;;  %v1585_v30 = vsel %vm1583_vm6, %v1582_v28, %v1576_v23 }
 0xc1e   :  { %v1584_v0 = vsel %vm1583_vm6, %v1581_v25, %v1574_v27  ;;  %v4126_v25 = vpack.c.bf16 %v1712_v2, %v1711_v19  ;;  %v1702_v27 = vrot.slane %v4860_v41, %v4729_v49 }
 0xc1f   :  { %3871 = vmatprep.mubr.msk.f32.mxu0 %vm163_vm2, %v1584_v0  ;;  %v1713_v0 = vld [vmem:[%s5145_s1 + $0x98] sm:$0xff] }
 0xc20   :  { %3872 = vmatmul.mubr.msk.f32.vlgmr.msra.gmra.mrb[16].mxu0 %vm163_vm2, %v1585_v30  ;;  %v1714_v30 = vld [vmem:[%s5145_s1 + $0xa0] sm:$0xff] }
 0xc21   :  { %3902 = vmatprep.mubr.msk.f32.mxu0 %vm4477_vm1, %v4478_v16 }
 0xcf3   :  { %v3873_v31 = vpop.f32.mrb[16].mxu0 }
 0xcf4   :  { %v1668_v32 = vadd.f32 %v3873_v31, %v1589_v40  ;;  %v1662_v33 = vpop.f32.mrb[17].mxu0 }
 0xcf5   :  { %v1663_v34 = vadd.f32 %v1662_v33, %v1589_v40  ;;  %v1845_v40 = vrot.slane %v4876_v62, 4 }
 0xcf6   :  { %v1672_v35 = vadd.f32 %v1668_v32, %v4594_v45  ;;  %v1708_v32 = vrot.slane %v4860_v41, %v4770_v29 }
 0xcf7   :  { %v1671_v36 = vadd.f32 %v1663_v34, %v4586_v44 }
 0xcf8   :  { %v1676_v37 = vsel %vm163_vm2, %v1672_v35, 0.0 }
 0xcf9   :  { %1677 = vadd.xlane.f32.xlu1 %v1676_v37  ;;  %v1673_v38 = vsel %vm163_vm2, %v1671_v36, 0.0 }
 0xcfa   :  { %1674 = vadd.xlane.f32.xlu0 %v1673_v38 }
 0xd0a   :  { %1726 = vperm.xlu1 %4222, %v1719_v14  }
 0xd0e   :  { %1736 = vperm.xlu1 %4222, %v1721_v1  }
 0xd12   :  { %1741 = vperm.xlu1 %4222, %v1722_v5  }
 0xd16   :  { %4265 = vset.pattern.permute.xlu1 %v4479_v18 }
 0xd17   :  { %1843 = vperm.xlu1 %4265, %v4876_v62  }
 0xd86   :  { %v1678_v51 = vpop.xlane.xlu1 %1677 }
 0xd87   :  { %v1680_v43 = vmul.f32 0.03125, %v1678_v51  ;;  %v1675_v45 = vpop.xlane.xlu0 %1674 }
 0xd88   :  { %v1679_v46 = vmul.f32 0.03125, %v1675_v45 }
 0xd89   :  { %v1682_v44 = vsub.f32 %v1672_v35, %v1680_v43  ;;  %v4130_v35 = vpack.c.bf16 %v1714_v30, %v1713_v0  ;;  %v4918_v43 = vld [vmem:[%s5145_s1] sm:$0xff] }
 0xd8a   :  { %v1681_v4 = vsub.f32 %v1671_v36, %v1679_v46  ;;  %v1727_v47 = vpop.permute.xlu1 %1726  ;;  %v1923_v46 = vrot.slane %v4876_v62, %v4613_v53 }
 0xd8b   :  { %v1684_v55 = vmul.f32 %v1682_v44, %v1682_v44  ;;  %v1819_v8 = vadd.f32 %v1818_v22, %v1727_v47 }
 0xd8c   :  { %v1683_v52 = vmul.f32 %v1681_v4, %v1681_v4 }
 0xd8d   :  { %v1688_v50 = vsel %vm163_vm2, %v1684_v55, 0.0  ;;  %v1837_v13 = vmax.f32 %v1819_v8, 0.0 }
 0xd8e   :  { %v1737_v54 = vpop.permute.xlu1 %1736  ;;  %1689 = vadd.xlane.f32.xlu0 %v1688_v50  ;;  %v1685_v59 = vsel %vm163_vm2, %v1683_v52, 0.0 }
 0xd8f   :  { %v1829_v56 = vadd.f32 %v1828_v20, %v1737_v54 }
 0xd91   :  { %v1839_v61 = vmax.f32 %v1829_v56, 0.0 }
 0xd92   :  { %v1742_v57 = vpop.permute.xlu1 %1741  ;;  %1686 = vadd.xlane.f32.xlu0 %v1685_v59 }
 0xd93   :  { %v1834_v60 = vadd.f32 %v3893_v42, %v1742_v57 }
 0xd95   :  { %v1840_v3 = vmax.f32 %v1834_v60, 0.0 }
 0xd96   :  { %v1844_v41 = vpop.permute.xlu1 %1843 }
 0xd97   :  { %v4124_v6 = vpack.c.bf16 %v1840_v3, %v1839_v61  ;;  %v1846_v38 = vrot.slane %v1844_v41, 4 }
 0xda8   :  { %1731 = vperm.xlu0 %4264, %v4830_v63  }
 0xdac   :  { %4306 = vset.pattern.permute.xlu0 %v4479_v18 }
 0xe1b   :  { %v1690_v11 = vpop.xlane.xlu0 %1689 }
 0xe1c   :  { %v1692_v58 = vmul.f32 0.03125, %v1690_v11 }
 0xe1e   :  { %v1694_v5 = vadd.f32 1e-05, %v1692_v58 }
 0xe1f   :  { %v1687_v14 = vpop.xlane.xlu0 %1686 }
 0xe20   :  { %v1691_v1 = vmul.f32 0.03125, %v1687_v14 }
 0xe22   :  { %v1693_v7 = vadd.f32 1e-05, %v1691_v1 }
 0xe24   :  { %4371 = vrsqrt.f32 %v1693_v7 }
 0xe25   :  { %4373 = vrsqrt.f32 %v1694_v5 }
 0xe27   :  { %v1732_v10 = vpop.permute.xlu0 %1731 }
 0xe28   :  { %v1824_v63 = vadd.f32 %v3890_v39, %v1732_v10 }
 0xe2a   :  { %v1838_v18 = vmax.f32 %v1824_v63, 0.0 }
 0xe2c   :  { %v4121_v17 = vpack.c.bf16 %v1838_v18, %v1837_v13 }
 0xe2e   :  { %v4372_v23 = vpop.eup %4371  ;;  %4122 = vmatpush3.bf16.msra.mxu0 %v4121_v17 }
 0xe2f   :  { %4123 = vmatprep.subr.bf16.mxu0 %v4476_v15  ;;  %v1697_v26 = vmul.f32 %v4372_v23, %v1681_v4  ;;  %v4374_v28 = vpop.eup %4373 }
 0xe30   :  { %v1698_v33 = vmul.f32 %v4374_v28, %v1682_v44  ;;  %v4926_v44 = vld [vmem:[%s5145_s1 + $0x8] sm:$0xff] }
 0xe31   :  { %v1703_v31 = vmul.f32 %v1702_v27, %v1697_v26 }
 0xe32   :  { %4125 = vmatpush3.bf16.msra.mxu0 %v4124_v6  ;;  %v1704_v36 = vmul.f32 %v1702_v27, %v1698_v33 }
 0xe33   :  { %4127 = vmatprep.subr.bf16.mxu0 %v4126_v25  ;;  %v4897_v34 = vadd.f32 %v1708_v32, %v1703_v31 }
 0xe34   :  { %v4902_v37 = vadd.f32 %v1708_v32, %v1704_v36 }
 0xe35   :  { %3903 = vmatmul.mubr.msk.f32.vlgmr.msra.gmra.mrb[18].mxu0 %vm163_vm2, %v1845_v40 }
 0xe36   :  { %4129 = vmatpush3.bf16.msra.mxu0 %v4126_v25  ;;  %3913 = vmatprep.mubr.msk.f32.mxu0 %vm163_vm2, %v4897_v34 }
 0xe37   :  { %4131 = vmatprep.subr.bf16.mxu0 %v4130_v35 }
 0xe3a   :  { %4133 = vmatpush3.bf16.msra.mxu0 %v4130_v35 }
 0xe3b   :  { %4141 = vmatprep.subr.bf16.mxu0 %v4604_v48 }
 0xe3d   :  { %3914 = vmatmul.mubr.msk.f32.vlgmr.msra.gmra.mrb[20].mxu0 %vm163_vm2, %v4902_v37 }
 0xe43   :  { %4143 = vmatpush3.bf16.xpose.msra.mxu0 %v4604_v48 }
 0xe44   :  { %4155 = vmatprep.subr.bf16.mxu0 %v4604_v48 }
 0xf08   :  { %v1916_v39 = vpop.f32.mrb[18].mxu0 }
 0xf09   :  { %v4909_v22 = vadd.f32 %v1916_v39, %v1846_v38  ;;  %v3904_v42 = vpop.f32.mrb[19].mxu0 }
 0xf0b   :  { %v2119_v20 = vrot.slane %v4909_v22, %v4613_v53  ;;  %v2426_v51 = vrot.slane %v4909_v22, %v4689_v24 }
 0xf0d   :  { %v2120_v45 = vmul.f32 %v4918_v43, %v2119_v20  ;;  %v2121_v4 = vmul.f32 %v4926_v44, %v2119_v20  ;;  %v2427_v47 = vmul.f32 %v4918_v43, %v2426_v51  ;;  %v2428_v59 = vmul.f32 %v4926_v44, %v2426_v51 }
 0xf0f   :  { %3927 = vmatprep.mubr.f32.mxu0 %v2120_v45 }
 0xf10   :  { %v3915_v55 = vpop.f32.mrb[20].mxu0  ;;  %3928 = vmatmul.mubr.f32.vlgmr.msra.gmra.mrb[22].mxu0 %v2121_v4 }
 0xf11   :  { %v4930_v50 = vadd.f32 %v3915_v55, %v1923_v46  ;;  %4157 = vmatpush3.bf16.xpose.msra.mxu0 %v4604_v48  ;;  %v1996_v52 = vpop.f32.mrb[21].mxu0  ;;  %3948 = vmatprep.mubr.f32.mxu0 %v2427_v47 }
 0xf12   :  { %v4933_v54 = vadd.f32 %v1996_v52, %v1923_v46 }
 0xf14   :  { %3920 = vmatprep.mubr.msk.f32.mxu1 %vm333_vm3, %v4933_v54  ;;  %v4939_v56 = vpack.i.bf16 %v4930_v50, %v4933_v54 }
 0xf16   :  { %4267 = vrot.lane.b32.xlu1 %v4939_v56, %s4480_s21 }
 0xf18   :  { %3949 = vmatmul.mubr.f32.vlgmr.msra.gmra.mrb[24].mxu0 %v2428_v59 }
 0xf88   :  { %v4268_v57 = vpop.permute.xlu1 %4267 }
 0xf89   :  { %v4270_v60 = vunpack.i.h.bf16 %v4268_v57  ;;  %v4269_v61 = vunpack.i.l.bf16 %v4268_v57 }
 0xf8b   :  { %v4134_v3 = vpack.c.bf16 %v4270_v60, %v4269_v61 }
 0xf8d   :  { %4136 = vmatprep.subr.msk.bf16.mxu1 %vm4648_vm4, %v4134_v3 }
 0xf8e   :  { %4139 = vmatpush3.bf16.xpose.msk.msra.mxu1 %vm4648_vm4, %v4134_v3 }
 0xf95   :  { %3921 = vmatmul.mubr.msk.f32.vlgmr.msra.gmra.mrb[20].mxu1 %vm333_vm3, %v4930_v50 }
 0xfe3   :  { %v3929_v6 = vpop.f32.mrb[22].mxu0 }
 0xfe4   :  { %v2188_v11 = vpop.f32.mrb[23].mxu0  ;;  %v2194_v18 = vadd.f32 %v3929_v6, %v4662_v21 }
 0xfe5   :  { %v2189_v58 = vadd.f32 %v2188_v11, %v4658_v12 }
 0xfe6   :  { %v2200_v19 = vsel %vm417_vm5, %v2194_v18, -inf }
 0xfe7   :  { %v2197_v14 = vsel %vm417_vm5, %v2189_v58, -inf }
 0xfe8   :  { %2198 = vmax.xlane.f32.xlu0 %v2197_v14 }
 0xfeb   :  { %v4952_v1 = vpop.f32.mrb[24].mxu0 }
 0xfec   :  { %v2495_v5 = vpop.f32.mrb[25].mxu0 }
 0xfed   :  { %v2496_v55 = vadd.f32 %v2495_v5, %v4658_v12 }
 0xfef   :  { %v2504_v52 = vsel %vm417_vm5, %v2496_v55, -inf }
0x1068   :  { %v3922_v7 = vpop.f32.mrb[20].mxu1 }
0x1069   :  { %v2091_v8 = vadd.f32 %v3922_v7, %v4662_v21  ;;  %v2085_v10 = vpop.f32.mrb[21].mxu1 }
0x106a   :  { %v2086_v63 = vadd.f32 %v2085_v10, %v4658_v12 }
0x106b   :  { %v2097_v13 = vsel %vm417_vm5, %v2091_v8, -inf }
0x106c   :  { %2098 = vmax.xlane.f32.xlu1 %v2097_v13  ;;  %v2094_v17 = vsel %vm417_vm5, %v2086_v63, -inf }
0x1070   :  { %2095 = vmax.xlane.f32.xlu1 %v2094_v17 }
0x1074   :  { %2201 = vmax.xlane.f32.xlu1 %v2200_v19 }
0x1075   :  { %v2199_v2 = vpop.xlane.xlu0 %2198 }
0x1076   :  { %v2203_v23 = vsub.f32 %v2189_v58, %v2199_v2 }
0x1078   :  { %v2205_v25 = vmul.f32 1.442695, %v2203_v23 }
0x107a   :  { %4375 = vpow2.f32 %v2205_v25 }
0x1084   :  { %v4376_v26 = vpop.eup %4375 }
0x1085   :  { %4272 = vrot.lane.b32.xlu1 %v4939_v56, %s4481_s26  ;;  %v2209_v27 = vsel %vm417_vm5, %v4376_v26, 0.0 }
0x1086   :  { %2210 = vadd.xlane.f32.xlu0 %v2209_v27 }
0x10f9   :  { %v2099_v28 = vpop.xlane.xlu1 %2098 }
0x10fa   :  { %v2101_v0 = vsub.f32 %v2091_v8, %v2099_v28 }
0x10fc   :  { %v2104_v30 = vmul.f32 1.442695, %v2101_v0 }
0x10fd   :  { %v2096_v40 = vpop.xlane.xlu1 %2095 }
0x10fe   :  { %4377 = vpow2.f32 %v2104_v30  ;;  %v2100_v31 = vsub.f32 %v2086_v63, %v2096_v40 }
0x1100   :  { %v2102_v32 = vmul.f32 1.442695, %v2100_v31 }
0x1101   :  { %v2202_v33 = vpop.xlane.xlu1 %2201 }
0x1102   :  { %4379 = vpow2.f32 %v2102_v32  ;;  %v2204_v35 = vsub.f32 %v2194_v18, %v2202_v33 }
0x1104   :  { %v2207_v36 = vmul.f32 1.442695, %v2204_v35 }
0x1105   :  { %v4273_v41 = vpop.permute.xlu1 %4272 }
0x1106   :  { %4381 = vpow2.f32 %v2207_v36  ;;  %v4275_v38 = vunpack.i.h.bf16 %v4273_v41  ;;  %v4274_v39 = vunpack.i.l.bf16 %v4273_v41 }
0x1108   :  { %v4378_v42 = vpop.eup %4377  ;;  %v4144_v20 = vpack.c.bf16 %v4275_v38, %v4274_v39 }
0x1109   :  { %v2109_v51 = vsel %vm417_vm5, %v4378_v42, 0.0 }
0x110a   :  { %2110 = vadd.xlane.f32.xlu1 %v2109_v51  ;;  %4145 = vmatprep.subr.bf16.mxu1 %v4144_v20 }
0x110b   :  { %4147 = vmatpush3.bf16.msra.mxu1 %v4144_v20  ;;  %v2501_v20 = vadd.f32 %v4952_v1, %v4662_v21 }
0x110c   :  { %v4380_v45 = vpop.eup %4379 }
0x110d   :  { %v2106_v46 = vsel %vm417_vm5, %v4380_v45, 0.0 }
0x110e   :  { %2107 = vadd.xlane.f32.xlu1 %v2106_v46 }
0x1110   :  { %v4382_v4 = vpop.eup %4381 }
0x1111   :  { %v2212_v47 = vsel %vm417_vm5, %v4382_v4, 0.0 }
0x1112   :  { %2213 = vadd.xlane.f32.xlu0 %v2212_v47 }
0x1113   :  { %v2211_v59 = vpop.xlane.xlu0 %2210 }
0x1114   :  { %4383 = vrcp.f32 %v2211_v59 }
0x111e   :  { %v4384_v6 = vpop.eup %4383 }
0x111f   :  { %2310 = vrot.lane.b32.xlu1 %v4933_v54, %s4483_s28  ;;  %v2216_v8 = vmul.f32 %v4384_v6, %v4376_v26 }
0x1123   :  { %2312 = vrot.lane.b32.xlu1 %v4930_v50, %s4483_s28 }
0x1128   :  { %4277 = vrot.lane.b32.xlu0 %v4939_v56, %s4482_s27 }
0x1147   :  { %2505 = vmax.xlane.f32.xlu1 %v2504_v52 }
0x1158   :  { %4282 = vrot.lane.b32.xlu1 %v4939_v56, %s4486_s3 }
0x1197   :  { %v2111_v57 = vpop.xlane.xlu1 %2110 }
0x119b   :  { %v2108_v60 = vpop.xlane.xlu1 %2107 }
0x119c   :  { %4385 = vrcp.f32 %v2108_v60 }
0x119d   :  { %4387 = vrcp.f32 %v2111_v57 }
0x119f   :  { %v2214_v61 = vpop.xlane.xlu0 %2213  ;;  %v2311_v25 = vpop.permute.xlu1 %2310 }
0x11a0   :  { %4389 = vrcp.f32 %v2214_v61 }
0x11a3   :  { %v4278_v3 = vpop.permute.xlu0 %4277  ;;  %v2313_v26 = vpop.permute.xlu1 %2312 }
0x11a4   :  { %v4280_v11 = vunpack.i.h.bf16 %v4278_v3  ;;  %v4279_v58 = vunpack.i.l.bf16 %v4278_v3 }
0x11a6   :  { %v4386_v14 = vpop.eup %4385  ;;  %v4148_v5 = vpack.c.bf16 %v4280_v11, %v4279_v58 }
0x11a7   :  { %v2113_v7 = vmul.f32 %v4386_v14, %v4380_v45  ;;  %v4388_v10 = vpop.eup %4387  ;;  %v2507_v45 = vsel %vm417_vm5, %v2501_v20, -inf }
0x11a8   :  { %4150 = vmatprep.subr.msk.bf16.mxu1 %vm4648_vm4, %v4148_v5  ;;  %v2115_v18 = vmul.f32 %v4388_v10, %v4378_v42 }
0x11a9   :  { %v2219_v63 = vadd.f32 %v2216_v8, %v2113_v7 }
0x11aa   :  { %v4390_v13 = vpop.eup %4389 }
0x11ab   :  { %v2218_v17 = vmul.f32 %v4390_v13, %v4382_v4  ;;  %v2221_v19 = vmul.f32 0.5, %v2219_v63 }
0x11ad   :  { %3934 = vmatprep.mubr.msk.f32.mxu1 %vm417_vm5, %v2221_v19  ;;  %v2220_v2 = vadd.f32 %v2218_v17, %v2115_v18 }
0x11af   :  { %v2222_v23 = vmul.f32 0.5, %v2220_v2 }
0x11b1   :  { %3935 = vmatmul.mubr.msk.f32.vlgmr.msra.gmra.mrb[22].mxu1 %vm417_vm5, %v2222_v23 }
0x11b2   :  { %4153 = vmatpush3.bf16.xpose.msk.msra.mxu1 %vm4648_vm4, %v4148_v5  ;;  %3941 = vmatprep.mubr.msk.f32.mxu1 %vm333_vm3, %v2311_v25 }
0x11b9   :  { %3942 = vmatmul.mubr.msk.f32.vlgmr.msra.gmra.mrb[24].mxu1 %vm333_vm3, %v2313_v26 }
0x11d4   :  { %v2506_v27 = vpop.xlane.xlu1 %2505 }
0x11d5   :  { %v2510_v33 = vsub.f32 %v2496_v55, %v2506_v27 }
0x11d7   :  { %v2512_v35 = vmul.f32 1.442695, %v2510_v33 }
0x11d8   :  { %v4283_v28 = vpop.permute.xlu1 %4282 }
0x11d9   :  { %v4285_v0 = vunpack.i.h.bf16 %v4283_v28  ;;  %v4284_v30 = vunpack.i.l.bf16 %v4283_v28  ;;  %4391 = vpow2.f32 %v2512_v35 }
0x11db   :  { %v4158_v40 = vpack.c.bf16 %v4285_v0, %v4284_v30 }
0x11dd   :  { %4159 = vmatprep.subr.bf16.mxu1 %v4158_v40 }
0x11de   :  { %4161 = vmatpush3.bf16.msra.mxu1 %v4158_v40 }
0x11df   :  { %4169 = vmatprep.subr.bf16.mxu1 %v4604_v48 }
0x11e3   :  { %v4392_v46 = vpop.eup %4391 }
0x11e4   :  { %v2516_v4 = vsel %vm417_vm5, %v4392_v46, 0.0 }
0x1284   :  { %v4985_v31 = vpop.f32.mrb[22].mxu1 }
0x1285   :  { %v4987_v32 = vpop.f32.mrb[23].mxu1 }
0x128c   :  { %v3943_v36 = vpop.f32.mrb[24].mxu1 }
0x128d   :  { %v2398_v41 = vadd.f32 %v3943_v36, %v4662_v21  ;;  %v2392_v38 = vpop.f32.mrb[25].mxu1 }
0x128e   :  { %v2393_v39 = vadd.f32 %v2392_v38, %v4658_v12 }
0x128f   :  { %v2404_v42 = vsel %vm417_vm5, %v2398_v41, -inf }
0x1290   :  { %2405 = vmax.xlane.f32.xlu0 %v2404_v42  ;;  %v2401_v51 = vsel %vm417_vm5, %v2393_v39, -inf }
0x1294   :  { %2402 = vmax.xlane.f32.xlu0 %v2401_v51 }
0x1298   :  { %2508 = vmax.xlane.f32.xlu0 %v2507_v45 }
0x129c   :  { %2517 = vadd.xlane.f32.xlu0 %v2516_v4 }
0x131d   :  { %v2406_v47 = vpop.xlane.xlu0 %2405 }
0x131e   :  { %v2408_v55 = vsub.f32 %v2398_v41, %v2406_v47  ;;  %v2733_v41 = vrot.slane %v4909_v22, %v4729_v49 }
0x1320   :  { %v2411_v52 = vmul.f32 1.442695, %v2408_v55  ;;  %v2735_v51 = vmul.f32 %v4926_v44, %v2733_v41 }
0x1321   :  { %v2403_v59 = vpop.xlane.xlu0 %2402 }
0x1322   :  { %4393 = vpow2.f32 %v2411_v52  ;;  %v2407_v57 = vsub.f32 %v2393_v39, %v2403_v59 }
0x1324   :  { %v2409_v60 = vmul.f32 1.442695, %v2407_v57 }
0x1325   :  { %v2509_v61 = vpop.xlane.xlu0 %2508 }
0x1326   :  { %4395 = vpow2.f32 %v2409_v60  ;;  %v2511_v1 = vsub.f32 %v2501_v20, %v2509_v61  ;;  %v2734_v20 = vmul.f32 %v4918_v43, %v2733_v41 }
0x1328   :  { %v2514_v3 = vmul.f32 1.442695, %v2511_v1 }
0x1329   :  { %v2518_v8 = vpop.xlane.xlu0 %2517 }
0x132a   :  { %4397 = vpow2.f32 %v2514_v3 }
0x132b   :  { %4399 = vrcp.f32 %v2518_v8 }
0x132c   :  { %v4394_v6 = vpop.eup %4393 }
0x132d   :  { %v2416_v11 = vsel %vm417_vm5, %v4394_v6, 0.0 }
0x132e   :  { %2417 = vadd.xlane.f32.xlu1 %v2416_v11 }
0x1330   :  { %v4396_v58 = vpop.eup %4395 }
0x1331   :  { %v2413_v14 = vsel %vm417_vm5, %v4396_v58, 0.0 }
0x1332   :  { %2414 = vadd.xlane.f32.xlu1 %v2413_v14 }
0x1334   :  { %v4398_v5 = vpop.eup %4397 }
0x1335   :  { %v2519_v7 = vsel %vm417_vm5, %v4398_v5, 0.0  ;;  %v4400_v19 = vpop.eup %4399 }
0x1336   :  { %2520 = vadd.xlane.f32.xlu0 %v2519_v7  ;;  %v2523_v28 = vmul.f32 %v4400_v19, %v4392_v46 }
0x1343   :  { %2617 = vrot.lane.b32.xlu1 %v4933_v54, %s4485_s30 }
0x1347   :  { %2619 = vrot.lane.b32.xlu1 %v4930_v50, %s4485_s30 }
0x134c   :  { %4287 = vrot.lane.b32.xlu0 %v4939_v56, %s4484_s29 }
0x13bb   :  { %v2418_v10 = vpop.xlane.xlu1 %2417 }
0x13bf   :  { %v2415_v63 = vpop.xlane.xlu1 %2414 }
0x13c0   :  { %4401 = vrcp.f32 %v2415_v63 }
0x13c1   :  { %4403 = vrcp.f32 %v2418_v10 }
0x13c3   :  { %v2618_v13 = vpop.permute.xlu1 %2617  ;;  %v2521_v18 = vpop.xlane.xlu0 %2520 }
0x13c4   :  { %4405 = vrcp.f32 %v2521_v18  ;;  %3962 = vmatprep.mubr.msk.f32.mxu0 %vm333_vm3, %v2618_v13 }
0x13c7   :  { %v4288_v17 = vpop.permute.xlu0 %4287  ;;  %v2620_v39 = vpop.permute.xlu1 %2619 }
0x13c8   :  { %v4290_v2 = vunpack.i.h.bf16 %v4288_v17  ;;  %v4289_v23 = vunpack.i.l.bf16 %v4288_v17 }
0x13ca   :  { %v4402_v25 = vpop.eup %4401  ;;  %v4162_v26 = vpack.c.bf16 %v4290_v2, %v4289_v23 }
0x13cb   :  { %v2420_v27 = vmul.f32 %v4402_v25, %v4396_v58  ;;  %v4404_v0 = vpop.eup %4403 }
0x13cc   :  { %4164 = vmatprep.subr.msk.bf16.mxu0 %vm4648_vm4, %v4162_v26  ;;  %v2422_v33 = vmul.f32 %v4404_v0, %v4394_v6 }
0x13cd   :  { %4167 = vmatpush3.bf16.xpose.msk.msra.mxu0 %vm4648_vm4, %v4162_v26  ;;  %v2526_v30 = vadd.f32 %v2523_v28, %v2420_v27 }
0x13ce   :  { %v4406_v40 = vpop.eup %4405 }
0x13cf   :  { %v2525_v35 = vmul.f32 %v4406_v40, %v4398_v5  ;;  %v2528_v36 = vmul.f32 0.5, %v2526_v30 }
0x13d1   :  { %3955 = vmatprep.mubr.msk.f32.mxu1 %vm417_vm5, %v2528_v36  ;;  %v2527_v38 = vadd.f32 %v2525_v35, %v2422_v33 }
0x13d3   :  { %v2529_v42 = vmul.f32 0.5, %v2527_v38 }
0x13d4   :  { %3963 = vmatmul.mubr.msk.f32.vlgmr.msra.gmra.mrb[26].mxu0 %vm333_vm3, %v2620_v39 }
0x13d5   :  { %3956 = vmatmul.mubr.msk.f32.vlgmr.msra.gmra.mrb[26].mxu1 %vm417_vm5, %v2529_v42 }
0x13d6   :  { %4171 = vmatpush3.bf16.xpose.msra.mxu1 %v4604_v48  ;;  %3969 = vmatprep.mubr.f32.mxu1 %v2734_v20 }
0x13dd   :  { %3970 = vmatmul.mubr.f32.vlgmr.msra.gmra.mrb[28].mxu1 %v2735_v51 }
0x14a7   :  { %v3964_v45 = vpop.f32.mrb[26].mxu0 }
0x14a8   :  { %v5019_v46 = vpop.f32.mrb[26].mxu1  ;;  %v2699_v4 = vpop.f32.mrb[27].mxu0  ;;  %v2705_v52 = vadd.f32 %v3964_v45, %v4662_v21 }
0x14a9   :  { %v2700_v47 = vadd.f32 %v2699_v4, %v4658_v12  ;;  %v5022_v55 = vpop.f32.mrb[27].mxu1 }
0x14aa   :  { %v2711_v57 = vsel %vm417_vm5, %v2705_v52, -inf }
0x14ab   :  { %v2708_v59 = vsel %vm417_vm5, %v2700_v47, -inf }
0x14ac   :  { %2709 = vmax.xlane.f32.xlu0 %v2708_v59 }
0x14b0   :  { %v3971_v60 = vpop.f32.mrb[28].mxu1  ;;  %2712 = vmax.xlane.f32.xlu0 %v2711_v57 }
0x14b1   :  { %v2808_v61 = vadd.f32 %v3971_v60, %v4662_v21  ;;  %v2802_v1 = vpop.f32.mrb[29].mxu1 }
0x14b2   :  { %v2803_v3 = vadd.f32 %v2802_v1, %v4658_v12 }
0x14b3   :  { %v2814_v6 = vsel %vm417_vm5, %v2808_v61, -inf }
0x14b4   :  { %v2811_v11 = vsel %vm417_vm5, %v2803_v3, -inf  ;;  %2815 = vmax.xlane.f32.xlu0 %v2814_v6 }
0x14b5   :  { %2812 = vmax.xlane.f32.xlu1 %v2811_v11 }
0x1539   :  { %v2710_v58 = vpop.xlane.xlu0 %2709 }
0x153a   :  { %v2714_v14 = vsub.f32 %v2700_v47, %v2710_v58  ;;  %v3040_v58 = vrot.slane %v4909_v22, %v4770_v29 }
0x153c   :  { %v2716_v5 = vmul.f32 1.442695, %v2714_v14  ;;  %v3042_v9 = vmul.f32 %v4926_v44, %v3040_v58 }
0x153d   :  { %v2713_v7 = vpop.xlane.xlu0 %2712 }
0x153e   :  { %4407 = vpow2.f32 %v2716_v5  ;;  %v2715_v8 = vsub.f32 %v2705_v52, %v2713_v7 }
0x1540   :  { %v2718_v10 = vmul.f32 1.442695, %v2715_v8  ;;  %v3041_v8 = vmul.f32 %v4918_v43, %v3040_v58 }
0x1541   :  { %v2816_v63 = vpop.xlane.xlu0 %2815 }
0x1542   :  { %4409 = vpow2.f32 %v2718_v10  ;;  %v2813_v13 = vpop.xlane.xlu1 %2812  ;;  %v2818_v18 = vsub.f32 %v2808_v61, %v2816_v63 }
0x1543   :  { %v2817_v17 = vsub.f32 %v2803_v3, %v2813_v13 }
0x1544   :  { %v2821_v19 = vmul.f32 1.442695, %v2818_v18 }
0x1545   :  { %v2819_v2 = vmul.f32 1.442695, %v2817_v17 }
0x1546   :  { %4411 = vpow2.f32 %v2821_v19 }
0x1547   :  { %4413 = vpow2.f32 %v2819_v2 }
0x1548   :  { %v4408_v23 = vpop.eup %4407 }
0x1549   :  { %v2720_v25 = vsel %vm417_vm5, %v4408_v23, 0.0 }
0x154a   :  { %2721 = vadd.xlane.f32.xlu1 %v2720_v25 }
0x154c   :  { %v4410_v26 = vpop.eup %4409 }
0x154d   :  { %v2723_v27 = vsel %vm417_vm5, %v4410_v26, 0.0 }
0x154e   :  { %2724 = vadd.xlane.f32.xlu1 %v2723_v27 }
0x1550   :  { %v4412_v28 = vpop.eup %4411 }
0x1551   :  { %v2826_v0 = vsel %vm417_vm5, %v4412_v28, 0.0  ;;  %v4414_v30 = vpop.eup %4413 }
0x1552   :  { %2827 = vadd.xlane.f32.xlu0 %v2826_v0  ;;  %v2823_v40 = vsel %vm417_vm5, %v4414_v30, 0.0 }
0x1556   :  { %2824 = vadd.xlane.f32.xlu0 %v2823_v40 }
0x155f   :  { %4292 = vrot.lane.b32.xlu1 %v4939_v56, %s4489_s6 }
0x1563   :  { %2924 = vrot.lane.b32.xlu1 %v4933_v54, %s4488_s5 }
0x1567   :  { %2926 = vrot.lane.b32.xlu1 %v4930_v50, %s4488_s5 }
0x156c   :  { %4297 = vrot.lane.b32.xlu0 %v4939_v56, %s4487_s4 }
0x15d7   :  { %v2722_v33 = vpop.xlane.xlu1 %2721 }
0x15db   :  { %v2725_v35 = vpop.xlane.xlu1 %2724 }
0x15df   :  { %v4293_v36 = vpop.permute.xlu1 %4292  ;;  %v2828_v41 = vpop.xlane.xlu0 %2827 }
0x15e0   :  { %v4295_v38 = vunpack.i.h.bf16 %v4293_v36  ;;  %v4294_v39 = vunpack.i.l.bf16 %v4293_v36  ;;  %4415 = vrcp.f32 %v2828_v41 }
0x15e1   :  { %4417 = vrcp.f32 %v2725_v35 }
0x15e2   :  { %4419 = vrcp.f32 %v2722_v33  ;;  %v4172_v42 = vpack.c.bf16 %v4295_v38, %v4294_v39 }
0x15e3   :  { %v2925_v20 = vpop.permute.xlu1 %2924  ;;  %v2825_v51 = vpop.xlane.xlu0 %2824 }
0x15e4   :  { %4421 = vrcp.f32 %v2825_v51  ;;  %4173 = vmatprep.subr.bf16.mxu0 %v4172_v42  ;;  %3983 = vmatprep.mubr.msk.f32.mxu1 %vm333_vm3, %v2925_v20 }
0x15e5   :  { %4175 = vmatpush3.bf16.msra.mxu0 %v4172_v42 }
0x15e6   :  { %4183 = vmatprep.subr.bf16.mxu0 %v4604_v48 }
0x15e7   :  { %v4298_v50 = vpop.permute.xlu0 %4297  ;;  %v2927_v14 = vpop.permute.xlu1 %2926 }
0x15e8   :  { %v4300_v54 = vunpack.i.h.bf16 %v4298_v50  ;;  %v4299_v45 = vunpack.i.l.bf16 %v4298_v50 }
0x15ea   :  { %v4416_v4 = vpop.eup %4415  ;;  %v4176_v47 = vpack.c.bf16 %v4300_v54, %v4299_v45 }
0x15eb   :  { %v4418_v52 = vpop.eup %4417  ;;  %v2832_v57 = vmul.f32 %v4416_v4, %v4412_v28 }
0x15ec   :  { %v4420_v59 = vpop.eup %4419  ;;  %4178 = vmatprep.subr.msk.bf16.mxu1 %vm4648_vm4, %v4176_v47  ;;  %v2729_v61 = vmul.f32 %v4418_v52, %v4410_v26 }
0x15ed   :  { %4181 = vmatpush3.bf16.xpose.msk.msra.mxu1 %vm4648_vm4, %v4176_v47  ;;  %v2727_v1 = vmul.f32 %v4420_v59, %v4408_v23 }
0x15ee   :  { %v4422_v60 = vpop.eup %4421  ;;  %v2834_v6 = vadd.f32 %v2832_v57, %v2729_v61 }
0x15ef   :  { %v2830_v3 = vmul.f32 %v4422_v60, %v4414_v30 }
0x15f0   :  { %v2836_v7 = vmul.f32 0.5, %v2834_v6 }
0x15f1   :  { %v2833_v11 = vadd.f32 %v2830_v3, %v2727_v1 }
0x15f3   :  { %v2835_v5 = vmul.f32 0.5, %v2833_v11 }
0x15f4   :  { %3984 = vmatmul.mubr.msk.f32.vlgmr.msra.gmra.mrb[30].mxu1 %vm333_vm3, %v2927_v14 }
0x15f5   :  { %3976 = vmatprep.mubr.msk.f32.mxu0 %vm417_vm5, %v2835_v5 }
0x15f6   :  { %3977 = vmatmul.mubr.msk.f32.vlgmr.msra.gmra.mrb[28].mxu0 %vm417_vm5, %v2836_v7 }
0x15f7   :  { %4185 = vmatpush3.bf16.xpose.msra.mxu0 %v4604_v48  ;;  %3990 = vmatprep.mubr.f32.mxu0 %v3041_v8 }
0x15fe   :  { %3991 = vmatmul.mubr.f32.vlgmr.msra.gmra.mrb[30].mxu0 %v3042_v9 }
0x16c7   :  { %v3985_v10 = vpop.f32.mrb[30].mxu1 }
0x16c8   :  { %v3006_v63 = vpop.f32.mrb[31].mxu1  ;;  %v3012_v17 = vadd.f32 %v3985_v10, %v4662_v21 }
0x16c9   :  { %v3007_v22 = vadd.f32 %v3006_v63, %v4658_v12  ;;  %v3978_v13 = vpop.f32.mrb[28].mxu0  ;;  %v1716_v63 = vld [vmem:[%s5145_s1 + $0xb0] sm:$0xff] }
0x16ca   :  { %v2915_v18 = vpop.f32.mrb[29].mxu0  ;;  %v3018_v43 = vsel %vm417_vm5, %v3012_v17, -inf }
0x16cb   :  { %v3015_v19 = vsel %vm417_vm5, %v3007_v22, -inf }
0x16cc   :  { %3016 = vmax.xlane.f32.xlu0 %v3015_v19 }
0x16d0   :  { %3019 = vmax.xlane.f32.xlu0 %v3018_v43 }
0x16d1   :  { %v3992_v2 = vpop.f32.mrb[30].mxu0 }
0x16d2   :  { %v3115_v48 = vadd.f32 %v3992_v2, %v4662_v21  ;;  %v3109_v23 = vpop.f32.mrb[31].mxu0 }
0x16d3   :  { %v3110_v44 = vadd.f32 %v3109_v23, %v4658_v12 }
0x16d4   :  { %v3121_v25 = vsel %vm417_vm5, %v3115_v48, -inf }
0x16d5   :  { %3122 = vmax.xlane.f32.xlu0 %v3121_v25  ;;  %v3118_v26 = vsel %vm417_vm5, %v3110_v44, -inf }
0x16d6   :  { %3119 = vmax.xlane.f32.xlu1 %v3118_v26 }
0x1759   :  { %v3017_v27 = vpop.xlane.xlu0 %3016 }
0x175a   :  { %v3021_v28 = vsub.f32 %v3007_v22, %v3017_v27  ;;  %v1717_v22 = vld [vmem:[%s5145_s1 + $0xb8] sm:$0xff] }
0x175c   :  { %v3023_v0 = vmul.f32 1.442695, %v3021_v28 }
0x175d   :  { %v3020_v30 = vpop.xlane.xlu0 %3019 }
0x175e   :  { %4423 = vpow2.f32 %v3023_v0  ;;  %v3022_v40 = vsub.f32 %v3012_v17, %v3020_v30 }
0x1760   :  { %v3025_v33 = vmul.f32 1.442695, %v3022_v40 }
0x1762   :  { %4425 = vpow2.f32 %v3025_v33  ;;  %v3123_v35 = vpop.xlane.xlu0 %3122 }
0x1763   :  { %v3125_v36 = vsub.f32 %v3115_v48, %v3123_v35  ;;  %v3120_v21 = vpop.xlane.xlu1 %3119 }
0x1764   :  { %v3124_v41 = vsub.f32 %v3110_v44, %v3120_v21 }
0x1765   :  { %v3128_v38 = vmul.f32 1.442695, %v3125_v36 }
0x1766   :  { %v3126_v12 = vmul.f32 1.442695, %v3124_v41 }
0x1768   :  { %v4424_v39 = vpop.eup %4423  ;;  %4427 = vpow2.f32 %v3126_v12 }
0x1769   :  { %v3027_v42 = vsel %vm417_vm5, %v4424_v39, 0.0  ;;  %4429 = vpow2.f32 %v3128_v38 }
0x176a   :  { %3028 = vadd.xlane.f32.xlu1 %v3027_v42 }
0x176c   :  { %v4426_v20 = vpop.eup %4425 }
0x176d   :  { %v3030_v51 = vsel %vm417_vm5, %v4426_v20, 0.0 }
0x176e   :  { %3031 = vadd.xlane.f32.xlu1 %v3030_v51 }
0x1772   :  { %v4428_v50 = vpop.eup %4427 }
0x1773   :  { %v3130_v54 = vsel %vm417_vm5, %v4428_v50, 0.0  ;;  %v4430_v45 = vpop.eup %4429 }
0x1774   :  { %3131 = vadd.xlane.f32.xlu0 %v3130_v54  ;;  %v3133_v4 = vsel %vm417_vm5, %v4430_v45, 0.0 }
0x1778   :  { %3134 = vadd.xlane.f32.xlu0 %v3133_v4 }
0x177f   :  { %4302 = vrot.lane.b32.xlu1 %v4939_v56, %s4491_s8 }
0x1783   :  { %3235 = vrot.lane.b32.xlu1 %v5019_v46, %s4490_s7 }
0x1787   :  { %3241 = vrot.lane.b32.xlu1 %v2915_v18, %s4492_s9  ;;  %v1718_v18 = vld [vmem:[%s5145_s1 + $0xc0] sm:$0xff] }
0x1788   :  { %v4194_v17 = vpack.c.bf16 %v1718_v18, %v1717_v22 }
0x178e   :  { %3233 = vrot.lane.b32.xlu0 %v5022_v55, %s4490_s7 }
0x1792   :  { %3243 = vrot.lane.b32.xlu0 %v3978_v13, %s4492_s9 }
0x17f7   :  { %v3029_v47 = vpop.xlane.xlu1 %3028 }
0x17f8   :  { %4431 = vrcp.f32 %v3029_v47 }
0x17fb   :  { %v3032_v52 = vpop.xlane.xlu1 %3031 }
0x17ff   :  { %v4303_v59 = vpop.permute.xlu1 %4302 }
0x1800   :  { %v4305_v57 = vunpack.i.h.bf16 %v4303_v59  ;;  %v4304_v60 = vunpack.i.l.bf16 %v4303_v59 }
0x1801   :  { %v3132_v61 = vpop.xlane.xlu0 %3131 }
0x1802   :  { %v4186_v1 = vpack.c.bf16 %v4305_v57, %v4304_v60  ;;  %4433 = vrcp.f32 %v3132_v61  ;;  %v4432_v46 = vpop.eup %4431 }
0x1803   :  { %4435 = vrcp.f32 %v3032_v52  ;;  %v3034_v3 = vmul.f32 %v4432_v46, %v4424_v39  ;;  %v3236_v2 = vpop.permute.xlu1 %3235 }
0x1804   :  { %4187 = vmatprep.subr.bf16.mxu1 %v4186_v1  ;;  %v3256_v26 = vsel %vm333_vm3, %v4985_v31, %v3236_v2 }
0x1805   :  { %v3135_v56 = vpop.xlane.xlu0 %3134  ;;  %4189 = vmatpush3.bf16.msra.mxu1 %v4186_v1  ;;  %v3377_v1 = vrot.slane %v4876_v62, %v4729_v49 }
0x1806   :  { %4437 = vrcp.f32 %v3135_v56  ;;  %4198 = vmatprep.subr.bf16.mxu1 %v4476_v15  ;;  %v1715_v15 = vld [vmem:[%s5145_s1 + $0xa8] sm:$0xff] }
0x1807   :  { %v4190_v13 = vpack.c.bf16 %v1716_v63, %v1715_v15  ;;  %v3242_v23 = vpop.permute.xlu1 %3241 }
0x1809   :  { %4191 = vmatprep.subr.bf16.mxu0 %v4190_v13  ;;  %v3234_v43 = vpop.permute.xlu0 %3233 }
0x180a   :  { %4193 = vmatpush3.bf16.msra.mxu0 %v4190_v13  ;;  %v3255_v44 = vsel %vm333_vm3, %v4987_v32, %v3234_v43  ;;  %v3264_v32 = vrot.slane %v4876_v62, %v4689_v24 }
0x180b   :  { %4195 = vmatprep.subr.bf16.mxu0 %v4194_v17  ;;  %v3257_v28 = vsel %vm417_vm5, %v3255_v44, %v3242_v23  ;;  %v3386_v44 = vld [vmem:[%s5145_s1 + $0xf0] sm:$0xff] }
0x180c   :  { %v4434_v55 = vpop.eup %4433 }
0x180d   :  { %v3137_v6 = vmul.f32 %v4434_v55, %v4428_v50  ;;  %v4436_v11 = vpop.eup %4435  ;;  %v3244_v48 = vpop.permute.xlu0 %3243 }
0x180e   :  { %v3036_v5 = vmul.f32 %v4436_v11, %v4426_v20  ;;  %4197 = vmatpush3.bf16.msra.mxu0 %v4194_v17  ;;  %v3258_v0 = vsel %vm417_vm5, %v3256_v26, %v3244_v48  ;;  %v4450_v17 = vld [vmem:[%s5144_s0] sm:$0xff]  ;;  %s4494_s0 = smov [#allocation2]  }
0x180f   :  { %v3140_v58 = vadd.f32 %v3137_v6, %v3034_v3  ;;  %v3383_v3 = vrot.slane %v4876_v62, %v4770_v29 }
0x1810   :  { %v4438_v14 = vpop.eup %4437 }
0x1811   :  { %v3139_v7 = vmul.f32 %v4438_v14, %v4430_v45  ;;  %v3142_v8 = vmul.f32 0.5, %v3140_v58 }
0x1813   :  { %3997 = vmatprep.mubr.msk.f32.mxu1 %vm417_vm5, %v3142_v8  ;;  %v3141_v9 = vadd.f32 %v3139_v7, %v3036_v5 }
0x1815   :  { %v3143_v10 = vmul.f32 0.5, %v3141_v9 }
0x1817   :  { %3998 = vmatmul.mubr.msk.f32.vlgmr.msra.gmra.mrb[32].mxu1 %vm417_vm5, %v3143_v10 }
0x1818   :  { %4015 = vmatprep.mubr.msk.f32.mxu1 %vm4477_vm1, %v4478_v16 }
0x18ea   :  { %v3999_v16 = vpop.f32.mrb[32].mxu1 }
0x18eb   :  { %3251 = vrot.lane.b32.xlu0 %v3999_v16, %s4493_s11  ;;  %v3222_v19 = vpop.f32.mrb[33].mxu1 }
0x18ec   :  { %3249 = vrot.lane.b32.xlu1 %v3222_v19, %s4493_s11 }
0x195d   :  { %v3252_v25 = vpop.permute.xlu0 %3251 }
0x195e   :  { %v3250_v27 = vpop.permute.xlu1 %3249  ;;  %v3260_v40 = vsel %vm1583_vm6, %v3258_v0, %v3252_v25  ;;  %v3416_v25 = vrot.slane %v3386_v44, %v4613_v53  ;;  %v3422_v0 = vrot.slane %v3386_v44, %v4689_v24 }
0x195f   :  { %v3259_v30 = vsel %vm1583_vm6, %v3257_v28, %v3250_v27 }
0x1960   :  { %4008 = vmatprep.mubr.msk.f32.mxu0 %vm163_vm2, %v3259_v30 }
0x1961   :  { %4009 = vmatmul.mubr.msk.f32.vlgmr.msra.gmra.mrb[32].mxu0 %vm163_vm2, %v3260_v40 }
0x1a34   :  { %v4010_v33 = vpop.f32.mrb[32].mxu0 }
0x1a35   :  { %v3343_v35 = vadd.f32 %v4010_v33, %v3264_v32  ;;  %v3337_v36 = vpop.f32.mrb[33].mxu0 }
0x1a36   :  { %v3338_v31 = vadd.f32 %v3337_v36, %v3264_v32 }
0x1a37   :  { %v3347_v21 = vadd.f32 %v3343_v35, %v4902_v37 }
0x1a38   :  { %v3346_v41 = vadd.f32 %v3338_v31, %v4897_v34 }
0x1a39   :  { %v3351_v38 = vsel %vm163_vm2, %v3347_v21, 0.0 }
0x1a3a   :  { %3352 = vadd.xlane.f32.xlu0 %v3351_v38  ;;  %v3348_v12 = vsel %vm163_vm2, %v3346_v41, 0.0 }
0x1a3b   :  { %3349 = vadd.xlane.f32.xlu1 %v3348_v12 }
0x1ac7   :  { %v3353_v39 = vpop.xlane.xlu0 %3352 }
0x1ac8   :  { %v3355_v42 = vmul.f32 0.03125, %v3353_v39  ;;  %v3350_v20 = vpop.xlane.xlu1 %3349 }
0x1ac9   :  { %v3354_v51 = vmul.f32 0.03125, %v3350_v20 }
0x1aca   :  { %v3357_v50 = vsub.f32 %v3347_v21, %v3355_v42 }
0x1acb   :  { %v3356_v54 = vsub.f32 %v3346_v41, %v3354_v51 }
0x1acc   :  { %v3359_v45 = vmul.f32 %v3357_v50, %v3357_v50 }
0x1acd   :  { %v3358_v4 = vmul.f32 %v3356_v54, %v3356_v54 }
0x1ace   :  { %v3363_v47 = vsel %vm163_vm2, %v3359_v45, 0.0 }
0x1acf   :  { %3364 = vadd.xlane.f32.xlu1 %v3363_v47  ;;  %v3360_v37 = vsel %vm163_vm2, %v3358_v4, 0.0 }
0x1ad0   :  { %3361 = vadd.xlane.f32.xlu0 %v3360_v37 }
0x1b5c   :  { %v3365_v34 = vpop.xlane.xlu1 %3364 }
0x1b5d   :  { %v3367_v52 = vmul.f32 0.03125, %v3365_v34  ;;  %v3362_v59 = vpop.xlane.xlu0 %3361 }
0x1b5e   :  { %v3366_v57 = vmul.f32 0.03125, %v3362_v59 }
0x1b5f   :  { %v3369_v60 = vadd.f32 1e-05, %v3367_v52 }
0x1b60   :  { %v3368_v61 = vadd.f32 1e-05, %v3366_v57 }
0x1b61   :  { %4439 = vrsqrt.f32 %v3369_v60 }
0x1b62   :  { %4441 = vrsqrt.f32 %v3368_v61 }
0x1b6b   :  { %v4440_v56 = vpop.eup %4439 }
0x1b6c   :  { %v4442_v46 = vpop.eup %4441  ;;  %v3373_v55 = vmul.f32 %v4440_v56, %v3357_v50 }
0x1b6d   :  { %v3372_v6 = vmul.f32 %v4442_v46, %v3356_v54 }
0x1b6e   :  { %v3379_v11 = vmul.f32 %v3377_v1, %v3373_v55 }
0x1b6f   :  { %v3378_v58 = vmul.f32 %v3377_v1, %v3372_v6 }
0x1b70   :  { %v3385_v14 = vadd.f32 %v3383_v3, %v3379_v11 }
0x1b71   :  { %v3384_v5 = vadd.f32 %v3383_v3, %v3378_v58 }
0x1b72   :  { %v3390_v7 = vsel %vm163_vm2, %v3385_v14, 0.0 }
0x1b73   :  { %3391 = vadd.xlane.f32.xlu1 %v3390_v7  ;;  %v3387_v8 = vsel %vm163_vm2, %v3384_v5, 0.0 }
0x1b74   :  { %3388 = vadd.xlane.f32.xlu0 %v3387_v8 }
0x1c00   :  { %v3392_v9 = vpop.xlane.xlu1 %3391 }
0x1c01   :  { %v3394_v10 = vmul.f32 0.03125, %v3392_v9  ;;  %v3389_v49 = vpop.xlane.xlu0 %3388 }
0x1c02   :  { %v3393_v15 = vmul.f32 0.03125, %v3389_v49 }
0x1c03   :  { %v3396_v63 = vsub.f32 %v3385_v14, %v3394_v10 }
0x1c04   :  { %v3395_v22 = vsub.f32 %v3384_v5, %v3393_v15 }
0x1c05   :  { %v3398_v13 = vmul.f32 %v3396_v63, %v3396_v63 }
0x1c06   :  { %v3397_v18 = vmul.f32 %v3395_v22, %v3395_v22 }
0x1c07   :  { %v3402_v29 = vsel %vm163_vm2, %v3398_v13, 0.0 }
0x1c08   :  { %3403 = vadd.xlane.f32.xlu1 %v3402_v29  ;;  %v3399_v62 = vsel %vm163_vm2, %v3397_v18, 0.0 }
0x1c09   :  { %3400 = vadd.xlane.f32.xlu0 %v3399_v62 }
0x1c1f   :  { %3425 = vrot.lane.b32.xlu0 %v4450_v17, %s4484_s29  ;;  %s3507_s29 = sshll.u32 %s4494_s0, 4  ;;  %s3508_s29 = int_to_ptr.vmem [resolvable:$true] %s3507_s29 }
0x1c20   :  { %s4451_s1 = scalar_lea.vmem %s3508_s29, 32  ;;  %p4456_p1 = scmp.lt.s32.totalorder %s3508_s29, %s3508_s29 }
0x1c21   :  { %p4452_p0 = scmp.ne.s32.totalorder %s3508_s29, %s4451_s1  ;;  %p4457_p2 = scmp.lt.s32.totalorder %s4451_s1, %s4451_s1 }
0x1c23   :  { %p4458_p3 = por %p4457_p2, %p4456_p1 }
0x1c25   :  { %p4459_p4 = pnand %p4458_p3, %p4452_p0 }
0x1c95   :  { %v3404_v16 = vpop.xlane.xlu1 %3403 }
0x1c96   :  { %v3406_v19 = vmul.f32 0.03125, %v3404_v16  ;;  %v3401_v43 = vpop.xlane.xlu0 %3400 }
0x1c97   :  { %v3405_v2 = vmul.f32 0.03125, %v3401_v43 }
0x1c98   :  { %v3408_v48 = vadd.f32 1e-05, %v3406_v19 }
0x1c99   :  { %v3407_v23 = vadd.f32 1e-05, %v3405_v2 }
0x1c9a   :  { %4443 = vrsqrt.f32 %v3408_v48  ;;  %v3426_v31 = vpop.permute.xlu0 %3425 }
0x1c9b   :  { %4445 = vrsqrt.f32 %v3407_v23 }
0x1ca4   :  { %v4444_v26 = vpop.eup %4443 }
0x1ca5   :  { %v4446_v27 = vpop.eup %4445  ;;  %v3412_v28 = vmul.f32 %v4444_v26, %v3396_v63 }
0x1ca6   :  { %v3411_v30 = vmul.f32 %v4446_v27, %v3395_v22 }
0x1ca7   :  { %v3418_v40 = vmul.f32 %v3416_v25, %v3412_v28 }
0x1ca8   :  { %v3417_v32 = vmul.f32 %v3416_v25, %v3411_v30 }
0x1ca9   :  { %v3424_v33 = vadd.f32 %v3422_v0, %v3418_v40 }
0x1caa   :  { %v3423_v35 = vadd.f32 %v3422_v0, %v3417_v32 }
0x1cac   :  { %v4199_v36 = vpack.c.bf16 %v3424_v33, %v3423_v35 }
0x1cae   :  { %4200 = vmatpush3.bf16.msra.mxu1 %v4199_v36 }
0x1cb1   :  { %4016 = vmatmul.mubr.msk.f32.vlgmr.msra.gmra.mrb[34].mxu1 %vm417_vm5, %v3426_v31 }
0x1d84   :  { %v3495_v53 = vpop.f32.mrb[34].mxu1 }
0x1d85   :  { %3500 = vst.msk [vmem:[#allocation2] sm:$0x3] %vm3499_vm7, %v3495_v53  ;;  %v4017_v21 = vpop.f32.mrb[35].mxu1 }
0x1d86   :  { %4462 = shalt.err (!%p4459_p4)
}
0x1d87   :  { %s4463_s15 = scalar_lea.hbm %s5146_s2, 32 }
0x1d88   :  { %p4464_p5 = scmp.ne.s32.totalorder %s5146_s2, %s4463_s15  ;;  %p4467_p6 = scmp.lt.u32.totalorder %s4463_s15, %s5146_s2 }
0x1d8a   :  { %p4469_p7 = pnand %p4467_p6, %p4464_p5 }
0x1d8c   :  { %4472 = shalt.err (!%p4469_p7)
}
0x1d8d   :  { %3510 = dma.vmem_to_hbm [thread:$0]  %s3508_s29, 32, %s5146_s2, [#allocation3]  }
0x1d8e   :  { %4473 = dma.done.wait [#allocation3], 32  }
0x1d8f   :  { %4474 = vsyncadd [#allocation3], 4294967264 }
0x1d90   :  { %3514 = vsyncpa [#allocation3], 1 }

</bundles_post_ra>
